<compile_context>
chip_gen: v5e
topology: v5e:2x2
jax: 0.10.0
libtpu: 0.0.40
codegen_flags: <defaults>
</compile_context>

<pallas_src>
import jax
import jax.numpy as jnp
import numpy as np
from jax import lax
from jax.experimental import pallas as pl
from jax.experimental.pallas import tpu as pltpu


def traj_attn_kernel(
    x_ref,       # (seq, IN)        current-step embeddings cat(loc, cluster, tim)
    hist_ref,    # (n_hist, IN)     per-session averaged history embeddings
    wih_ref,     # (3, IN, H)       GRU input weights, per gate (r, z, n), transposed
    whh_ref,     # (3, H, H)        GRU hidden weights, per gate, transposed
    bih_ref,     # (3, H)
    bhh_ref,     # (3, H)
    wattn_ref,   # (IN, H)          fc_attn weight (transposed)
    battn_ref,   # (1, H)
    uid_ref,     # (1, U)           uid embedding row
    wfh_ref,     # (H, L)           fc_final rows multiplying out_state
    wfc_ref,     # (H, L)           fc_final rows multiplying context
    wfu_ref,     # (U, L)           fc_final rows multiplying uid embedding
    bfin_ref,    # (1, L)
    out_ref,     # (target_len, L)
    hs_ref,      # scratch VMEM (target_len, H) -- tail of the GRU outputs
):
    seq_len = x_ref.shape[0]
    H = whh_ref.shape[1]
    target_len = out_ref.shape[0]
    tail_start = seq_len - target_len

    x = x_ref[...]                                   # (seq, IN)
    bih = bih_ref[...]
    bhh = bhh_ref[...]

    # ---- input-side gate pre-activations, hoisted out of the recurrence ----
    # Three (seq, IN) x (IN, H) MXU matmuls; bih folded in once (not per step).
    gi_r = jnp.dot(x, wih_ref[0], preferred_element_type=jnp.float32) + bih[0:1, :]
    gi_z = jnp.dot(x, wih_ref[1], preferred_element_type=jnp.float32) + bih[1:2, :]
    gi_n = jnp.dot(x, wih_ref[2], preferred_element_type=jnp.float32) + bih[2:3, :]

    whh_r = whh_ref[0]
    whh_z = whh_ref[1]
    whh_n = whh_ref[2]
    bhh_r = bhh[0:1, :]
    bhh_z = bhh[1:2, :]
    bhh_n = bhh[2:3, :]

    # ---- GRU recurrence, fully unrolled (small static trip count) ----
    # Only h @ whh_* remains on the serial dependence chain.
    h = jnp.zeros((1, H), dtype=jnp.float32)
    for t in range(seq_len):
        gh_r = jnp.dot(h, whh_r, preferred_element_type=jnp.float32) + bhh_r
        gh_z = jnp.dot(h, whh_z, preferred_element_type=jnp.float32) + bhh_z
        gh_n = jnp.dot(h, whh_n, preferred_element_type=jnp.float32) + bhh_n
        r = jax.nn.sigmoid(gi_r[t:t + 1, :] + gh_r)
        z = jax.nn.sigmoid(gi_z[t:t + 1, :] + gh_z)
        n = jnp.tanh(gi_n[t:t + 1, :] + r * gh_n)
        h = (1.0 - z) * n + z * h
        if t >= tail_start:                          # only the attended tail is kept
            k = t - tail_start
            hs_ref[k:k + 1, :] = h                   # static-offset store
    out_tail = hs_ref[...]                           # (target_len, H)

    # ---- history projection: tanh(fc_attn(history)) ----
    history = jnp.tanh(
        jnp.dot(hist_ref[...], wattn_ref[...], preferred_element_type=jnp.float32)
        + battn_ref[...])                            # (n_hist, H)

    # ---- dot attention + softmax + context ----
    energies = lax.dot_general(                      # out_tail @ history.T
        out_tail, history,
        dimension_numbers=(((1,), (1,)), ((), ())),
        preferred_element_type=jnp.float32)          # (target_len, n_hist)
    e_max = jnp.max(energies, axis=-1, keepdims=True)
    e_exp = jnp.exp(energies - e_max)
    attn_w = e_exp / jnp.sum(e_exp, axis=-1, keepdims=True)
    context = jnp.dot(attn_w, history, preferred_element_type=jnp.float32)

    # ---- fc_final (split matmul over the concat chunks) + log_softmax ----
    y = (jnp.dot(out_tail, wfh_ref[...], preferred_element_type=jnp.float32)
         + jnp.dot(context, wfc_ref[...], preferred_element_type=jnp.float32)
         + jnp.dot(uid_ref[...], wfu_ref[...], preferred_element_type=jnp.float32)
         + bfin_ref[...])
    m = jnp.max(y, axis=-1, keepdims=True)
    lse = jnp.log(jnp.sum(jnp.exp(y - m), axis=-1, keepdims=True)) + m
    out_ref[...] = y - lse


def traj_pre_attn_avg_long_user(loc, tim, cluster, history_loc, history_cluster,
                                history_tim, history_count, uid, target_len,
                                params):
    """Embedding gathers + ragged history averaging in JAX, then one Pallas call."""
    (emb_loc, emb_tim, emb_uid, emb_cluster, wih, whh, bih, bhh,
     wattn_T, battn, wfh, wfc, wfu, bfin) = params

    # current trajectory: cat(loc_emb, cluster_emb, tim_emb), dropout = identity
    x = jnp.concatenate(
        [emb_loc[loc], emb_cluster[cluster], emb_tim[tim]], axis=-1)   # (seq, IN)

    # ragged per-session averaging of the history, as one averaging matmul
    counts = history_count.astype(jnp.float32)
    offsets = jnp.cumsum(history_count) - history_count                # exclusive cumsum
    hist_len = history_loc.shape[0]
    j = jnp.arange(hist_len)[None, :]
    in_seg = (j >= offsets[:, None]) & (j < (offsets + history_count)[:, None])
    avg_mat = in_seg.astype(jnp.float32) / counts[:, None]             # (n_hist, hist_len)

    loc_h = avg_mat @ emb_loc[history_loc]
    clu_h = avg_mat @ emb_cluster[history_cluster]
    tim_h = emb_tim[history_tim][offsets]                              # first tim per session
    hist_x = jnp.concatenate([loc_h, clu_h, tim_h], axis=-1)           # (n_hist, IN)

    uid_emb = emb_uid[uid]                                             # (1, U)

    H = whh.shape[1]
    loc_size = wfh.shape[1]

    dense_inputs = (x, hist_x, wih, whh, bih, bhh, wattn_T, battn, uid_emb,
                    wfh, wfc, wfu, bfin)
    in_specs = [pl.BlockSpec(a.shape, lambda i, nd=a.ndim: (0,) * nd)
                for a in dense_inputs]

    return pl.pallas_call(
        traj_attn_kernel,
        out_shape=jax.ShapeDtypeStruct((target_len, loc_size), jnp.float32),
        grid=(1,),
        in_specs=in_specs,
        out_specs=pl.BlockSpec((target_len, loc_size), lambda i: (0, 0)),
        scratch_shapes=[pltpu.VMEM((target_len, H), jnp.float32)],
        compiler_params=pltpu.CompilerParams(
            dimension_semantics=("arbitrary",)),
    )(*dense_inputs)


def traj_ref(loc, tim, cluster, history_loc, history_cluster, history_tim,
             history_count, uid, target_len, params):
    """Pure-JAX reference mirroring the PyTorch forward pass."""
    (emb_loc, emb_tim, emb_uid, emb_cluster, wih, whh, bih, bhh,
     wattn_T, battn, wfh, wfc, wfu, bfin) = params
    H = whh.shape[1]

    x = jnp.concatenate(
        [emb_loc[loc], emb_cluster[cluster], emb_tim[tim]], axis=-1)

    def step(h, xt):
        xt = xt[None, :]
        r = jax.nn.sigmoid(xt @ wih[0] + bih[0:1] + h @ whh[0] + bhh[0:1])
        z = jax.nn.sigmoid(xt @ wih[1] + bih[1:2] + h @ whh[1] + bhh[1:2])
        n = jnp.tanh(xt @ wih[2] + bih[2:3] + r * (h @ whh[2] + bhh[2:3]))
        hn = (1.0 - z) * n + z * h
        return hn, hn[0]

    h0 = jnp.zeros((1, H), jnp.float32)
    _, hs = lax.scan(step, h0, x)                                      # (seq, H)
    out_tail = hs[hs.shape[0] - target_len:]

    loc_eh = emb_loc[history_loc]
    clu_eh = emb_cluster[history_cluster]
    tim_eh = emb_tim[history_tim]
    rows_l, rows_c, rows_t = [], [], []
    cnt = 0
    for c in np.asarray(history_count).tolist():
        rows_l.append(jnp.mean(loc_eh[cnt:cnt + c], axis=0))
        rows_c.append(jnp.mean(clu_eh[cnt:cnt + c], axis=0))
        rows_t.append(tim_eh[cnt])
        cnt += c
    hist_x = jnp.concatenate(
        [jnp.stack(rows_l), jnp.stack(rows_c), jnp.stack(rows_t)], axis=-1)

    history = jnp.tanh(hist_x @ wattn_T + battn)                       # (n_hist, H)
    energies = out_tail @ history.T
    attn_w = jax.nn.softmax(energies, axis=-1)
    context = attn_w @ history
    uid_rep = jnp.broadcast_to(emb_uid[uid], (target_len, emb_uid.shape[1]))
    out = jnp.concatenate([out_tail, context, uid_rep], axis=1)
    y = out @ jnp.concatenate([wfh, wfc, wfu], axis=0) + bfin
    return jax.nn.log_softmax(y, axis=-1)


def make_params(key, loc_size, loc_emb, tim_size, tim_emb, uid_size, uid_emb,
                cluster_size, cluster_emb, hidden):
    IN = loc_emb + tim_emb + cluster_emb
    ks = jax.random.split(key, 8)
    emb_loc = jax.random.normal(ks[0], (loc_size, loc_emb), jnp.float32)
    emb_tim = jax.random.normal(ks[1], (tim_size, tim_emb), jnp.float32)
    emb_uid = jax.random.normal(ks[2], (uid_size, uid_emb), jnp.float32)
    emb_cluster = jax.random.normal(ks[3], (cluster_size, cluster_emb), jnp.float32)

    # GRU: weight_ih xavier_uniform (3H, IN); weight_hh orthogonal (3H, H);
    # init_weights zeros every bias parameter.
    a = float(np.sqrt(6.0 / (3 * hidden + IN)))
    w_ih = jax.random.uniform(ks[4], (3 * hidden, IN), jnp.float32, -a, a)
    q, _ = np.linalg.qr(np.asarray(jax.random.normal(ks[5], (3 * hidden, hidden))))
    w_hh = jnp.asarray(q, jnp.float32)
    # per-gate, transposed layout: gate g uses rows [g*H, (g+1)*H)
    wih = jnp.stack([w_ih[g * hidden:(g + 1) * hidden].T for g in range(3)])   # (3, IN, H)
    whh = jnp.stack([w_hh[g * hidden:(g + 1) * hidden].T for g in range(3)])   # (3, H, H)
    bih = jnp.zeros((3, hidden), jnp.float32)
    bhh = jnp.zeros((3, hidden), jnp.float32)

    # fc_attn: Linear(IN -> H), default-init weight, bias zeroed by init_weights
    b1 = 1.0 / float(np.sqrt(IN))
    wattn_T = jax.random.uniform(ks[6], (IN, hidden), jnp.float32, -b1, b1)
    battn = jnp.zeros((1, hidden), jnp.float32)

    # fc_final: Linear(2H + U -> loc_size), default-init weight, bias zeroed
    fan_in = 2 * hidden + uid_emb
    b2 = 1.0 / float(np.sqrt(fan_in))
    w_final_T = jax.random.uniform(ks[7], (fan_in, loc_size), jnp.float32, -b2, b2)
    wfh = w_final_T[:hidden]
    wfc = w_final_T[hidden:2 * hidden]
    wfu = w_final_T[2 * hidden:]
    bfin = jnp.zeros((1, loc_size), jnp.float32)

    return (emb_loc, emb_tim, emb_uid, emb_cluster, wih, whh, bih, bhh,
            wattn_T, battn, wfh, wfc, wfu, bfin)


if __name__ == "__main__":
    LOC_SIZE, LOC_EMB = 128, 32
    TIM_SIZE, TIM_EMB = 48, 16
    UID_SIZE, UID_EMB = 16, 16
    CLU_SIZE, CLU_EMB = 32, 16
    HIDDEN = 32
    SEQ = 8
    TARGET_LEN = 5
    HISTORY_COUNT = np.array([1, 2, 3, 1, 2, 3], dtype=np.int32)   # 6 sessions, 12 visits

    key = jax.random.PRNGKey(0)
    kp, k1, k2, k3, k4, k5, k6 = jax.random.split(key, 7)
    params = make_params(kp, LOC_SIZE, LOC_EMB, TIM_SIZE, TIM_EMB,
                         UID_SIZE, UID_EMB, CLU_SIZE, CLU_EMB, HIDDEN)

    hist_len = int(HISTORY_COUNT.sum())
    loc = jax.random.randint(k1, (SEQ,), 0, LOC_SIZE, dtype=jnp.int32)
    tim = jax.random.randint(k2, (SEQ,), 0, TIM_SIZE, dtype=jnp.int32)
    cluster = jax.random.randint(k3, (SEQ,), 0, CLU_SIZE, dtype=jnp.int32)
    history_loc = jax.random.randint(k4, (hist_len,), 0, LOC_SIZE, dtype=jnp.int32)
    history_cluster = jax.random.randint(k5, (hist_len,), 0, CLU_SIZE, dtype=jnp.int32)
    history_tim = jax.random.randint(k6, (hist_len,), 0, TIM_SIZE, dtype=jnp.int32)
    history_count = jnp.asarray(HISTORY_COUNT)
    uid = jnp.array([3], dtype=jnp.int32)

    out = traj_pre_attn_avg_long_user(loc, tim, cluster, history_loc,
                                      history_cluster, history_tim,
                                      history_count, uid, TARGET_LEN, params)
    out = jax.block_until_ready(out)

    ref = jax.block_until_ready(
        traj_ref(loc, tim, cluster, history_loc, history_cluster, history_tim,
                 HISTORY_COUNT, uid, TARGET_LEN, params))
    np.testing.assert_allclose(np.asarray(out), np.asarray(ref),
                               rtol=1e-3, atol=1e-3)
    print("KERNEL_OK")
</pallas_src>

<mosaic_0001>
module attributes {stable_mosaic.version = 11 : i64} {
  func.func @traj_attn_kernel(%arg0: i32, %arg1: memref<8x64xf32, #tpu.memory_space<vmem>>, %arg2: memref<6x64xf32, #tpu.memory_space<vmem>>, %arg3: memref<3x64x32xf32, #tpu.memory_space<vmem>>, %arg4: memref<3x32x32xf32, #tpu.memory_space<vmem>>, %arg5: memref<3x32xf32, #tpu.memory_space<vmem>>, %arg6: memref<3x32xf32, #tpu.memory_space<vmem>>, %arg7: memref<64x32xf32, #tpu.memory_space<vmem>>, %arg8: memref<1x32xf32, #tpu.memory_space<vmem>>, %arg9: memref<1x16xf32, #tpu.memory_space<vmem>>, %arg10: memref<32x128xf32, #tpu.memory_space<vmem>>, %arg11: memref<32x128xf32, #tpu.memory_space<vmem>>, %arg12: memref<16x128xf32, #tpu.memory_space<vmem>>, %arg13: memref<1x128xf32, #tpu.memory_space<vmem>>, %arg14: memref<5x128xf32, #tpu.memory_space<vmem>>, %arg15: memref<5x32xf32, #tpu.memory_space<vmem>>) attributes {dimension_semantics = [#tpu.dimension_semantics<arbitrary>], iteration_bounds = array<i64: 1>, scalar_prefetch = 0 : i64, scratch_operands = 1 : i64, tpu.core_type = #tpu.core_type<tc>, window_params = [{pipeline_mode = #tpu.pipeline_mode<synchronous>, transform_indices = @transform_0, window_bounds = array<i64: 8, 64>}, {pipeline_mode = #tpu.pipeline_mode<synchronous>, transform_indices = @transform_1, window_bounds = array<i64: 6, 64>}, {pipeline_mode = #tpu.pipeline_mode<synchronous>, transform_indices = @transform_2, window_bounds = array<i64: 3, 64, 32>}, {pipeline_mode = #tpu.pipeline_mode<synchronous>, transform_indices = @transform_3, window_bounds = array<i64: 3, 32, 32>}, {pipeline_mode = #tpu.pipeline_mode<synchronous>, transform_indices = @transform_4, window_bounds = array<i64: 3, 32>}, {pipeline_mode = #tpu.pipeline_mode<synchronous>, transform_indices = @transform_5, window_bounds = array<i64: 3, 32>}, {pipeline_mode = #tpu.pipeline_mode<synchronous>, transform_indices = @transform_6, window_bounds = array<i64: 64, 32>}, {pipeline_mode = #tpu.pipeline_mode<synchronous>, transform_indices = @transform_7, window_bounds = array<i64: 1, 32>}, {pipeline_mode = #tpu.pipeline_mode<synchronous>, transform_indices = @transform_8, window_bounds = array<i64: 1, 16>}, {pipeline_mode = #tpu.pipeline_mode<synchronous>, transform_indices = @transform_9, window_bounds = array<i64: 32, 128>}, {pipeline_mode = #tpu.pipeline_mode<synchronous>, transform_indices = @transform_10, window_bounds = array<i64: 32, 128>}, {pipeline_mode = #tpu.pipeline_mode<synchronous>, transform_indices = @transform_11, window_bounds = array<i64: 16, 128>}, {pipeline_mode = #tpu.pipeline_mode<synchronous>, transform_indices = @transform_12, window_bounds = array<i64: 1, 128>}, {pipeline_mode = #tpu.pipeline_mode<synchronous>, transform_indices = @transform_13, window_bounds = array<i64: 5, 128>}]} {
    %c0 = arith.constant 0 : index
    %c0_0 = arith.constant 0 : index
    %0 = vector.load %arg1[%c0, %c0_0] : memref<8x64xf32, #tpu.memory_space<vmem>>, vector<8x64xf32>
    %c0_1 = arith.constant 0 : index
    %c0_2 = arith.constant 0 : index
    %1 = vector.load %arg5[%c0_1, %c0_2] : memref<3x32xf32, #tpu.memory_space<vmem>>, vector<3x32xf32>
    %c0_3 = arith.constant 0 : index
    %c0_4 = arith.constant 0 : index
    %2 = vector.load %arg6[%c0_3, %c0_4] : memref<3x32xf32, #tpu.memory_space<vmem>>, vector<3x32xf32>
    %c0_5 = arith.constant 0 : index
    %c0_6 = arith.constant 0 : index
    %c0_7 = arith.constant 0 : index
    %3 = vector.load %arg3[%c0_5, %c0_6, %c0_7] : memref<3x64x32xf32, #tpu.memory_space<vmem>>, vector<1x64x32xf32>
    %4 = vector.shape_cast %3 : vector<1x64x32xf32> to vector<64x32xf32>
    %cst = arith.constant dense<0.000000e+00> : vector<8x32xf32>
    %5 = tpu.matmul %0, %4, %cst {dimension_numbers = #tpu.dot_dimension_numbers<[1], [0], [0], [1], [0, 0, 1, 1], [], []>} : vector<8x64xf32>, vector<64x32xf32>, vector<8x32xf32> -> vector<8x32xf32>
    %6 = vector.extract_strided_slice %1 {offsets = [0, 0], sizes = [1, 32], strides = [1, 1]} : vector<3x32xf32> to vector<1x32xf32>
    %7 = vector.broadcast %6 : vector<1x32xf32> to vector<8x32xf32>
    %8 = arith.addf %5, %7 : vector<8x32xf32>
    %c1 = arith.constant 1 : index
    %c0_8 = arith.constant 0 : index
    %c0_9 = arith.constant 0 : index
    %9 = vector.load %arg3[%c1, %c0_8, %c0_9] : memref<3x64x32xf32, #tpu.memory_space<vmem>>, vector<1x64x32xf32>
    %10 = vector.shape_cast %9 : vector<1x64x32xf32> to vector<64x32xf32>
    %cst_10 = arith.constant dense<0.000000e+00> : vector<8x32xf32>
    %11 = tpu.matmul %0, %10, %cst_10 {dimension_numbers = #tpu.dot_dimension_numbers<[1], [0], [0], [1], [0, 0, 1, 1], [], []>} : vector<8x64xf32>, vector<64x32xf32>, vector<8x32xf32> -> vector<8x32xf32>
    %12 = vector.extract_strided_slice %1 {offsets = [1, 0], sizes = [1, 32], strides = [1, 1]} : vector<3x32xf32> to vector<1x32xf32>
    %13 = vector.broadcast %12 : vector<1x32xf32> to vector<8x32xf32>
    %14 = arith.addf %11, %13 : vector<8x32xf32>
    %c2 = arith.constant 2 : index
    %c0_11 = arith.constant 0 : index
    %c0_12 = arith.constant 0 : index
    %15 = vector.load %arg3[%c2, %c0_11, %c0_12] : memref<3x64x32xf32, #tpu.memory_space<vmem>>, vector<1x64x32xf32>
    %16 = vector.shape_cast %15 : vector<1x64x32xf32> to vector<64x32xf32>
    %cst_13 = arith.constant dense<0.000000e+00> : vector<8x32xf32>
    %17 = tpu.matmul %0, %16, %cst_13 {dimension_numbers = #tpu.dot_dimension_numbers<[1], [0], [0], [1], [0, 0, 1, 1], [], []>} : vector<8x64xf32>, vector<64x32xf32>, vector<8x32xf32> -> vector<8x32xf32>
    %18 = vector.extract_strided_slice %1 {offsets = [2, 0], sizes = [1, 32], strides = [1, 1]} : vector<3x32xf32> to vector<1x32xf32>
    %19 = vector.broadcast %18 : vector<1x32xf32> to vector<8x32xf32>
    %20 = arith.addf %17, %19 : vector<8x32xf32>
    %c0_14 = arith.constant 0 : index
    %c0_15 = arith.constant 0 : index
    %c0_16 = arith.constant 0 : index
    %21 = vector.load %arg4[%c0_14, %c0_15, %c0_16] : memref<3x32x32xf32, #tpu.memory_space<vmem>>, vector<1x32x32xf32>
    %22 = vector.shape_cast %21 : vector<1x32x32xf32> to vector<32x32xf32>
    %c1_17 = arith.constant 1 : index
    %c0_18 = arith.constant 0 : index
    %c0_19 = arith.constant 0 : index
    %23 = vector.load %arg4[%c1_17, %c0_18, %c0_19] : memref<3x32x32xf32, #tpu.memory_space<vmem>>, vector<1x32x32xf32>
    %24 = vector.shape_cast %23 : vector<1x32x32xf32> to vector<32x32xf32>
    %c2_20 = arith.constant 2 : index
    %c0_21 = arith.constant 0 : index
    %c0_22 = arith.constant 0 : index
    %25 = vector.load %arg4[%c2_20, %c0_21, %c0_22] : memref<3x32x32xf32, #tpu.memory_space<vmem>>, vector<1x32x32xf32>
    %26 = vector.shape_cast %25 : vector<1x32x32xf32> to vector<32x32xf32>
    %27 = vector.extract_strided_slice %2 {offsets = [0, 0], sizes = [1, 32], strides = [1, 1]} : vector<3x32xf32> to vector<1x32xf32>
    %28 = vector.extract_strided_slice %2 {offsets = [1, 0], sizes = [1, 32], strides = [1, 1]} : vector<3x32xf32> to vector<1x32xf32>
    %29 = vector.extract_strided_slice %2 {offsets = [2, 0], sizes = [1, 32], strides = [1, 1]} : vector<3x32xf32> to vector<1x32xf32>
    %cst_23 = arith.constant 0.000000e+00 : f32
    %30 = vector.broadcast %cst_23 : f32 to vector<1x32xf32>
    %cst_24 = arith.constant dense<0.000000e+00> : vector<1x32xf32>
    %31 = tpu.matmul %30, %22, %cst_24 {dimension_numbers = #tpu.dot_dimension_numbers<[1], [0], [0], [1], [0, 0, 1, 1], [], []>} : vector<1x32xf32>, vector<32x32xf32>, vector<1x32xf32> -> vector<1x32xf32>
    %32 = arith.addf %31, %27 : vector<1x32xf32>
    %cst_25 = arith.constant dense<0.000000e+00> : vector<1x32xf32>
    %33 = tpu.matmul %30, %24, %cst_25 {dimension_numbers = #tpu.dot_dimension_numbers<[1], [0], [0], [1], [0, 0, 1, 1], [], []>} : vector<1x32xf32>, vector<32x32xf32>, vector<1x32xf32> -> vector<1x32xf32>
    %34 = arith.addf %33, %28 : vector<1x32xf32>
    %cst_26 = arith.constant dense<0.000000e+00> : vector<1x32xf32>
    %35 = tpu.matmul %30, %26, %cst_26 {dimension_numbers = #tpu.dot_dimension_numbers<[1], [0], [0], [1], [0, 0, 1, 1], [], []>} : vector<1x32xf32>, vector<32x32xf32>, vector<1x32xf32> -> vector<1x32xf32>
    %36 = arith.addf %35, %29 : vector<1x32xf32>
    %37 = vector.extract_strided_slice %8 {offsets = [0, 0], sizes = [1, 32], strides = [1, 1]} : vector<8x32xf32> to vector<1x32xf32>
    %38 = arith.addf %37, %32 : vector<1x32xf32>
    %39 = arith.negf %38 : vector<1x32xf32>
    %40 = math.exp %39 : vector<1x32xf32>
    %cst_27 = arith.constant 1.000000e+00 : f32
    %41 = vector.broadcast %cst_27 : f32 to vector<1x32xf32>
    %42 = arith.addf %41, %40 : vector<1x32xf32>
    %43 = arith.divf %41, %42 : vector<1x32xf32>
    %44 = vector.extract_strided_slice %14 {offsets = [0, 0], sizes = [1, 32], strides = [1, 1]} : vector<8x32xf32> to vector<1x32xf32>
    %45 = arith.addf %44, %34 : vector<1x32xf32>
    %46 = arith.negf %45 : vector<1x32xf32>
    %47 = math.exp %46 : vector<1x32xf32>
    %cst_28 = arith.constant 1.000000e+00 : f32
    %48 = vector.broadcast %cst_28 : f32 to vector<1x32xf32>
    %49 = arith.addf %48, %47 : vector<1x32xf32>
    %50 = arith.divf %48, %49 : vector<1x32xf32>
    %51 = vector.extract_strided_slice %20 {offsets = [0, 0], sizes = [1, 32], strides = [1, 1]} : vector<8x32xf32> to vector<1x32xf32>
    %52 = arith.mulf %43, %36 : vector<1x32xf32>
    %53 = arith.addf %51, %52 : vector<1x32xf32>
    %54 = math.tanh %53 : vector<1x32xf32>
    %cst_29 = arith.constant 1.000000e+00 : f32
    %55 = vector.broadcast %cst_29 : f32 to vector<1x32xf32>
    %56 = arith.subf %55, %50 : vector<1x32xf32>
    %57 = arith.mulf %56, %54 : vector<1x32xf32>
    %58 = arith.mulf %50, %30 : vector<1x32xf32>
    %59 = arith.addf %57, %58 : vector<1x32xf32>
    %cst_30 = arith.constant dense<0.000000e+00> : vector<1x32xf32>
    %60 = tpu.matmul %59, %22, %cst_30 {dimension_numbers = #tpu.dot_dimension_numbers<[1], [0], [0], [1], [0, 0, 1, 1], [], []>} : vector<1x32xf32>, vector<32x32xf32>, vector<1x32xf32> -> vector<1x32xf32>
    %61 = arith.addf %60, %27 : vector<1x32xf32>
    %cst_31 = arith.constant dense<0.000000e+00> : vector<1x32xf32>
    %62 = tpu.matmul %59, %24, %cst_31 {dimension_numbers = #tpu.dot_dimension_numbers<[1], [0], [0], [1], [0, 0, 1, 1], [], []>} : vector<1x32xf32>, vector<32x32xf32>, vector<1x32xf32> -> vector<1x32xf32>
    %63 = arith.addf %62, %28 : vector<1x32xf32>
    %cst_32 = arith.constant dense<0.000000e+00> : vector<1x32xf32>
    %64 = tpu.matmul %59, %26, %cst_32 {dimension_numbers = #tpu.dot_dimension_numbers<[1], [0], [0], [1], [0, 0, 1, 1], [], []>} : vector<1x32xf32>, vector<32x32xf32>, vector<1x32xf32> -> vector<1x32xf32>
    %65 = arith.addf %64, %29 : vector<1x32xf32>
    %66 = vector.extract_strided_slice %8 {offsets = [1, 0], sizes = [1, 32], strides = [1, 1]} : vector<8x32xf32> to vector<1x32xf32>
    %67 = arith.addf %66, %61 : vector<1x32xf32>
    %68 = arith.negf %67 : vector<1x32xf32>
    %69 = math.exp %68 : vector<1x32xf32>
    %cst_33 = arith.constant 1.000000e+00 : f32
    %70 = vector.broadcast %cst_33 : f32 to vector<1x32xf32>
    %71 = arith.addf %70, %69 : vector<1x32xf32>
    %72 = arith.divf %70, %71 : vector<1x32xf32>
    %73 = vector.extract_strided_slice %14 {offsets = [1, 0], sizes = [1, 32], strides = [1, 1]} : vector<8x32xf32> to vector<1x32xf32>
    %74 = arith.addf %73, %63 : vector<1x32xf32>
    %75 = arith.negf %74 : vector<1x32xf32>
    %76 = math.exp %75 : vector<1x32xf32>
    %cst_34 = arith.constant 1.000000e+00 : f32
    %77 = vector.broadcast %cst_34 : f32 to vector<1x32xf32>
    %78 = arith.addf %77, %76 : vector<1x32xf32>
    %79 = arith.divf %77, %78 : vector<1x32xf32>
    %80 = vector.extract_strided_slice %20 {offsets = [1, 0], sizes = [1, 32], strides = [1, 1]} : vector<8x32xf32> to vector<1x32xf32>
    %81 = arith.mulf %72, %65 : vector<1x32xf32>
    %82 = arith.addf %80, %81 : vector<1x32xf32>
    %83 = math.tanh %82 : vector<1x32xf32>
    %cst_35 = arith.constant 1.000000e+00 : f32
    %84 = vector.broadcast %cst_35 : f32 to vector<1x32xf32>
    %85 = arith.subf %84, %79 : vector<1x32xf32>
    %86 = arith.mulf %85, %83 : vector<1x32xf32>
    %87 = arith.mulf %79, %59 : vector<1x32xf32>
    %88 = arith.addf %86, %87 : vector<1x32xf32>
    %cst_36 = arith.constant dense<0.000000e+00> : vector<1x32xf32>
    %89 = tpu.matmul %88, %22, %cst_36 {dimension_numbers = #tpu.dot_dimension_numbers<[1], [0], [0], [1], [0, 0, 1, 1], [], []>} : vector<1x32xf32>, vector<32x32xf32>, vector<1x32xf32> -> vector<1x32xf32>
    %90 = arith.addf %89, %27 : vector<1x32xf32>
    %cst_37 = arith.constant dense<0.000000e+00> : vector<1x32xf32>
    %91 = tpu.matmul %88, %24, %cst_37 {dimension_numbers = #tpu.dot_dimension_numbers<[1], [0], [0], [1], [0, 0, 1, 1], [], []>} : vector<1x32xf32>, vector<32x32xf32>, vector<1x32xf32> -> vector<1x32xf32>
    %92 = arith.addf %91, %28 : vector<1x32xf32>
    %cst_38 = arith.constant dense<0.000000e+00> : vector<1x32xf32>
    %93 = tpu.matmul %88, %26, %cst_38 {dimension_numbers = #tpu.dot_dimension_numbers<[1], [0], [0], [1], [0, 0, 1, 1], [], []>} : vector<1x32xf32>, vector<32x32xf32>, vector<1x32xf32> -> vector<1x32xf32>
    %94 = arith.addf %93, %29 : vector<1x32xf32>
    %95 = vector.extract_strided_slice %8 {offsets = [2, 0], sizes = [1, 32], strides = [1, 1]} : vector<8x32xf32> to vector<1x32xf32>
    %96 = arith.addf %95, %90 : vector<1x32xf32>
    %97 = arith.negf %96 : vector<1x32xf32>
    %98 = math.exp %97 : vector<1x32xf32>
    %cst_39 = arith.constant 1.000000e+00 : f32
    %99 = vector.broadcast %cst_39 : f32 to vector<1x32xf32>
    %100 = arith.addf %99, %98 : vector<1x32xf32>
    %101 = arith.divf %99, %100 : vector<1x32xf32>
    %102 = vector.extract_strided_slice %14 {offsets = [2, 0], sizes = [1, 32], strides = [1, 1]} : vector<8x32xf32> to vector<1x32xf32>
    %103 = arith.addf %102, %92 : vector<1x32xf32>
    %104 = arith.negf %103 : vector<1x32xf32>
    %105 = math.exp %104 : vector<1x32xf32>
    %cst_40 = arith.constant 1.000000e+00 : f32
    %106 = vector.broadcast %cst_40 : f32 to vector<1x32xf32>
    %107 = arith.addf %106, %105 : vector<1x32xf32>
    %108 = arith.divf %106, %107 : vector<1x32xf32>
    %109 = vector.extract_strided_slice %20 {offsets = [2, 0], sizes = [1, 32], strides = [1, 1]} : vector<8x32xf32> to vector<1x32xf32>
    %110 = arith.mulf %101, %94 : vector<1x32xf32>
    %111 = arith.addf %109, %110 : vector<1x32xf32>
    %112 = math.tanh %111 : vector<1x32xf32>
    %cst_41 = arith.constant 1.000000e+00 : f32
    %113 = vector.broadcast %cst_41 : f32 to vector<1x32xf32>
    %114 = arith.subf %113, %108 : vector<1x32xf32>
    %115 = arith.mulf %114, %112 : vector<1x32xf32>
    %116 = arith.mulf %108, %88 : vector<1x32xf32>
    %117 = arith.addf %115, %116 : vector<1x32xf32>
    %cst_42 = arith.constant dense<0.000000e+00> : vector<1x32xf32>
    %118 = tpu.matmul %117, %22, %cst_42 {dimension_numbers = #tpu.dot_dimension_numbers<[1], [0], [0], [1], [0, 0, 1, 1], [], []>} : vector<1x32xf32>, vector<32x32xf32>, vector<1x32xf32> -> vector<1x32xf32>
    %119 = arith.addf %118, %27 : vector<1x32xf32>
    %cst_43 = arith.constant dense<0.000000e+00> : vector<1x32xf32>
    %120 = tpu.matmul %117, %24, %cst_43 {dimension_numbers = #tpu.dot_dimension_numbers<[1], [0], [0], [1], [0, 0, 1, 1], [], []>} : vector<1x32xf32>, vector<32x32xf32>, vector<1x32xf32> -> vector<1x32xf32>
    %121 = arith.addf %120, %28 : vector<1x32xf32>
    %cst_44 = arith.constant dense<0.000000e+00> : vector<1x32xf32>
    %122 = tpu.matmul %117, %26, %cst_44 {dimension_numbers = #tpu.dot_dimension_numbers<[1], [0], [0], [1], [0, 0, 1, 1], [], []>} : vector<1x32xf32>, vector<32x32xf32>, vector<1x32xf32> -> vector<1x32xf32>
    %123 = arith.addf %122, %29 : vector<1x32xf32>
    %124 = vector.extract_strided_slice %8 {offsets = [3, 0], sizes = [1, 32], strides = [1, 1]} : vector<8x32xf32> to vector<1x32xf32>
    %125 = arith.addf %124, %119 : vector<1x32xf32>
    %126 = arith.negf %125 : vector<1x32xf32>
    %127 = math.exp %126 : vector<1x32xf32>
    %cst_45 = arith.constant 1.000000e+00 : f32
    %128 = vector.broadcast %cst_45 : f32 to vector<1x32xf32>
    %129 = arith.addf %128, %127 : vector<1x32xf32>
    %130 = arith.divf %128, %129 : vector<1x32xf32>
    %131 = vector.extract_strided_slice %14 {offsets = [3, 0], sizes = [1, 32], strides = [1, 1]} : vector<8x32xf32> to vector<1x32xf32>
    %132 = arith.addf %131, %121 : vector<1x32xf32>
    %133 = arith.negf %132 : vector<1x32xf32>
    %134 = math.exp %133 : vector<1x32xf32>
    %cst_46 = arith.constant 1.000000e+00 : f32
    %135 = vector.broadcast %cst_46 : f32 to vector<1x32xf32>
    %136 = arith.addf %135, %134 : vector<1x32xf32>
    %137 = arith.divf %135, %136 : vector<1x32xf32>
    %138 = vector.extract_strided_slice %20 {offsets = [3, 0], sizes = [1, 32], strides = [1, 1]} : vector<8x32xf32> to vector<1x32xf32>
    %139 = arith.mulf %130, %123 : vector<1x32xf32>
    %140 = arith.addf %138, %139 : vector<1x32xf32>
    %141 = math.tanh %140 : vector<1x32xf32>
    %cst_47 = arith.constant 1.000000e+00 : f32
    %142 = vector.broadcast %cst_47 : f32 to vector<1x32xf32>
    %143 = arith.subf %142, %137 : vector<1x32xf32>
    %144 = arith.mulf %143, %141 : vector<1x32xf32>
    %145 = arith.mulf %137, %117 : vector<1x32xf32>
    %146 = arith.addf %144, %145 : vector<1x32xf32>
    %c0_48 = arith.constant 0 : index
    %c0_49 = arith.constant 0 : index
    %147 = vector.load %arg15[%c0_48, %c0_49] : memref<5x32xf32, #tpu.memory_space<vmem>>, vector<1x32xf32>
    tpu.vector_store %arg15[%c0_48, %c0_49], %146 {strides = array<i32>} : memref<5x32xf32, #tpu.memory_space<vmem>>, vector<1x32xf32>,
    %cst_50 = arith.constant dense<0.000000e+00> : vector<1x32xf32>
    %148 = tpu.matmul %146, %22, %cst_50 {dimension_numbers = #tpu.dot_dimension_numbers<[1], [0], [0], [1], [0, 0, 1, 1], [], []>} : vector<1x32xf32>, vector<32x32xf32>, vector<1x32xf32> -> vector<1x32xf32>
    %149 = arith.addf %148, %27 : vector<1x32xf32>
    %cst_51 = arith.constant dense<0.000000e+00> : vector<1x32xf32>
    %150 = tpu.matmul %146, %24, %cst_51 {dimension_numbers = #tpu.dot_dimension_numbers<[1], [0], [0], [1], [0, 0, 1, 1], [], []>} : vector<1x32xf32>, vector<32x32xf32>, vector<1x32xf32> -> vector<1x32xf32>
    %151 = arith.addf %150, %28 : vector<1x32xf32>
    %cst_52 = arith.constant dense<0.000000e+00> : vector<1x32xf32>
    %152 = tpu.matmul %146, %26, %cst_52 {dimension_numbers = #tpu.dot_dimension_numbers<[1], [0], [0], [1], [0, 0, 1, 1], [], []>} : vector<1x32xf32>, vector<32x32xf32>, vector<1x32xf32> -> vector<1x32xf32>
    %153 = arith.addf %152, %29 : vector<1x32xf32>
    %154 = vector.extract_strided_slice %8 {offsets = [4, 0], sizes = [1, 32], strides = [1, 1]} : vector<8x32xf32> to vector<1x32xf32>
    %155 = arith.addf %154, %149 : vector<1x32xf32>
    %156 = arith.negf %155 : vector<1x32xf32>
    %157 = math.exp %156 : vector<1x32xf32>
    %cst_53 = arith.constant 1.000000e+00 : f32
    %158 = vector.broadcast %cst_53 : f32 to vector<1x32xf32>
    %159 = arith.addf %158, %157 : vector<1x32xf32>
    %160 = arith.divf %158, %159 : vector<1x32xf32>
    %161 = vector.extract_strided_slice %14 {offsets = [4, 0], sizes = [1, 32], strides = [1, 1]} : vector<8x32xf32> to vector<1x32xf32>
    %162 = arith.addf %161, %151 : vector<1x32xf32>
    %163 = arith.negf %162 : vector<1x32xf32>
    %164 = math.exp %163 : vector<1x32xf32>
    %cst_54 = arith.constant 1.000000e+00 : f32
    %165 = vector.broadcast %cst_54 : f32 to vector<1x32xf32>
    %166 = arith.addf %165, %164 : vector<1x32xf32>
    %167 = arith.divf %165, %166 : vector<1x32xf32>
    %168 = vector.extract_strided_slice %20 {offsets = [4, 0], sizes = [1, 32], strides = [1, 1]} : vector<8x32xf32> to vector<1x32xf32>
    %169 = arith.mulf %160, %153 : vector<1x32xf32>
    %170 = arith.addf %168, %169 : vector<1x32xf32>
    %171 = math.tanh %170 : vector<1x32xf32>
    %cst_55 = arith.constant 1.000000e+00 : f32
    %172 = vector.broadcast %cst_55 : f32 to vector<1x32xf32>
    %173 = arith.subf %172, %167 : vector<1x32xf32>
    %174 = arith.mulf %173, %171 : vector<1x32xf32>
    %175 = arith.mulf %167, %146 : vector<1x32xf32>
    %176 = arith.addf %174, %175 : vector<1x32xf32>
    %c1_56 = arith.constant 1 : index
    %c0_57 = arith.constant 0 : index
    %177 = vector.load %arg15[%c1_56, %c0_57] : memref<5x32xf32, #tpu.memory_space<vmem>>, vector<1x32xf32>
    tpu.vector_store %arg15[%c1_56, %c0_57], %176 {strides = array<i32>} : memref<5x32xf32, #tpu.memory_space<vmem>>, vector<1x32xf32>,
    %cst_58 = arith.constant dense<0.000000e+00> : vector<1x32xf32>
    %178 = tpu.matmul %176, %22, %cst_58 {dimension_numbers = #tpu.dot_dimension_numbers<[1], [0], [0], [1], [0, 0, 1, 1], [], []>} : vector<1x32xf32>, vector<32x32xf32>, vector<1x32xf32> -> vector<1x32xf32>
    %179 = arith.addf %178, %27 : vector<1x32xf32>
    %cst_59 = arith.constant dense<0.000000e+00> : vector<1x32xf32>
    %180 = tpu.matmul %176, %24, %cst_59 {dimension_numbers = #tpu.dot_dimension_numbers<[1], [0], [0], [1], [0, 0, 1, 1], [], []>} : vector<1x32xf32>, vector<32x32xf32>, vector<1x32xf32> -> vector<1x32xf32>
    %181 = arith.addf %180, %28 : vector<1x32xf32>
    %cst_60 = arith.constant dense<0.000000e+00> : vector<1x32xf32>
    %182 = tpu.matmul %176, %26, %cst_60 {dimension_numbers = #tpu.dot_dimension_numbers<[1], [0], [0], [1], [0, 0, 1, 1], [], []>} : vector<1x32xf32>, vector<32x32xf32>, vector<1x32xf32> -> vector<1x32xf32>
    %183 = arith.addf %182, %29 : vector<1x32xf32>
    %184 = vector.extract_strided_slice %8 {offsets = [5, 0], sizes = [1, 32], strides = [1, 1]} : vector<8x32xf32> to vector<1x32xf32>
    %185 = arith.addf %184, %179 : vector<1x32xf32>
    %186 = arith.negf %185 : vector<1x32xf32>
    %187 = math.exp %186 : vector<1x32xf32>
    %cst_61 = arith.constant 1.000000e+00 : f32
    %188 = vector.broadcast %cst_61 : f32 to vector<1x32xf32>
    %189 = arith.addf %188, %187 : vector<1x32xf32>
    %190 = arith.divf %188, %189 : vector<1x32xf32>
    %191 = vector.extract_strided_slice %14 {offsets = [5, 0], sizes = [1, 32], strides = [1, 1]} : vector<8x32xf32> to vector<1x32xf32>
    %192 = arith.addf %191, %181 : vector<1x32xf32>
    %193 = arith.negf %192 : vector<1x32xf32>
    %194 = math.exp %193 : vector<1x32xf32>
    %cst_62 = arith.constant 1.000000e+00 : f32
    %195 = vector.broadcast %cst_62 : f32 to vector<1x32xf32>
    %196 = arith.addf %195, %194 : vector<1x32xf32>
    %197 = arith.divf %195, %196 : vector<1x32xf32>
    %198 = vector.extract_strided_slice %20 {offsets = [5, 0], sizes = [1, 32], strides = [1, 1]} : vector<8x32xf32> to vector<1x32xf32>
    %199 = arith.mulf %190, %183 : vector<1x32xf32>
    %200 = arith.addf %198, %199 : vector<1x32xf32>
    %201 = math.tanh %200 : vector<1x32xf32>
    %cst_63 = arith.constant 1.000000e+00 : f32
    %202 = vector.broadcast %cst_63 : f32 to vector<1x32xf32>
    %203 = arith.subf %202, %197 : vector<1x32xf32>
    %204 = arith.mulf %203, %201 : vector<1x32xf32>
    %205 = arith.mulf %197, %176 : vector<1x32xf32>
    %206 = arith.addf %204, %205 : vector<1x32xf32>
    %c2_64 = arith.constant 2 : index
    %c0_65 = arith.constant 0 : index
    %207 = vector.load %arg15[%c2_64, %c0_65] : memref<5x32xf32, #tpu.memory_space<vmem>>, vector<1x32xf32>
    tpu.vector_store %arg15[%c2_64, %c0_65], %206 {strides = array<i32>} : memref<5x32xf32, #tpu.memory_space<vmem>>, vector<1x32xf32>,
    %cst_66 = arith.constant dense<0.000000e+00> : vector<1x32xf32>
    %208 = tpu.matmul %206, %22, %cst_66 {dimension_numbers = #tpu.dot_dimension_numbers<[1], [0], [0], [1], [0, 0, 1, 1], [], []>} : vector<1x32xf32>, vector<32x32xf32>, vector<1x32xf32> -> vector<1x32xf32>
    %209 = arith.addf %208, %27 : vector<1x32xf32>
    %cst_67 = arith.constant dense<0.000000e+00> : vector<1x32xf32>
    %210 = tpu.matmul %206, %24, %cst_67 {dimension_numbers = #tpu.dot_dimension_numbers<[1], [0], [0], [1], [0, 0, 1, 1], [], []>} : vector<1x32xf32>, vector<32x32xf32>, vector<1x32xf32> -> vector<1x32xf32>
    %211 = arith.addf %210, %28 : vector<1x32xf32>
    %cst_68 = arith.constant dense<0.000000e+00> : vector<1x32xf32>
    %212 = tpu.matmul %206, %26, %cst_68 {dimension_numbers = #tpu.dot_dimension_numbers<[1], [0], [0], [1], [0, 0, 1, 1], [], []>} : vector<1x32xf32>, vector<32x32xf32>, vector<1x32xf32> -> vector<1x32xf32>
    %213 = arith.addf %212, %29 : vector<1x32xf32>
    %214 = vector.extract_strided_slice %8 {offsets = [6, 0], sizes = [1, 32], strides = [1, 1]} : vector<8x32xf32> to vector<1x32xf32>
    %215 = arith.addf %214, %209 : vector<1x32xf32>
    %216 = arith.negf %215 : vector<1x32xf32>
    %217 = math.exp %216 : vector<1x32xf32>
    %cst_69 = arith.constant 1.000000e+00 : f32
    %218 = vector.broadcast %cst_69 : f32 to vector<1x32xf32>
    %219 = arith.addf %218, %217 : vector<1x32xf32>
    %220 = arith.divf %218, %219 : vector<1x32xf32>
    %221 = vector.extract_strided_slice %14 {offsets = [6, 0], sizes = [1, 32], strides = [1, 1]} : vector<8x32xf32> to vector<1x32xf32>
    %222 = arith.addf %221, %211 : vector<1x32xf32>
    %223 = arith.negf %222 : vector<1x32xf32>
    %224 = math.exp %223 : vector<1x32xf32>
    %cst_70 = arith.constant 1.000000e+00 : f32
    %225 = vector.broadcast %cst_70 : f32 to vector<1x32xf32>
    %226 = arith.addf %225, %224 : vector<1x32xf32>
    %227 = arith.divf %225, %226 : vector<1x32xf32>
    %228 = vector.extract_strided_slice %20 {offsets = [6, 0], sizes = [1, 32], strides = [1, 1]} : vector<8x32xf32> to vector<1x32xf32>
    %229 = arith.mulf %220, %213 : vector<1x32xf32>
    %230 = arith.addf %228, %229 : vector<1x32xf32>
    %231 = math.tanh %230 : vector<1x32xf32>
    %cst_71 = arith.constant 1.000000e+00 : f32
    %232 = vector.broadcast %cst_71 : f32 to vector<1x32xf32>
    %233 = arith.subf %232, %227 : vector<1x32xf32>
    %234 = arith.mulf %233, %231 : vector<1x32xf32>
    %235 = arith.mulf %227, %206 : vector<1x32xf32>
    %236 = arith.addf %234, %235 : vector<1x32xf32>
    %c3 = arith.constant 3 : index
    %c0_72 = arith.constant 0 : index
    %237 = vector.load %arg15[%c3, %c0_72] : memref<5x32xf32, #tpu.memory_space<vmem>>, vector<1x32xf32>
    tpu.vector_store %arg15[%c3, %c0_72], %236 {strides = array<i32>} : memref<5x32xf32, #tpu.memory_space<vmem>>, vector<1x32xf32>,
    %cst_73 = arith.constant dense<0.000000e+00> : vector<1x32xf32>
    %238 = tpu.matmul %236, %22, %cst_73 {dimension_numbers = #tpu.dot_dimension_numbers<[1], [0], [0], [1], [0, 0, 1, 1], [], []>} : vector<1x32xf32>, vector<32x32xf32>, vector<1x32xf32> -> vector<1x32xf32>
    %239 = arith.addf %238, %27 : vector<1x32xf32>
    %cst_74 = arith.constant dense<0.000000e+00> : vector<1x32xf32>
    %240 = tpu.matmul %236, %24, %cst_74 {dimension_numbers = #tpu.dot_dimension_numbers<[1], [0], [0], [1], [0, 0, 1, 1], [], []>} : vector<1x32xf32>, vector<32x32xf32>, vector<1x32xf32> -> vector<1x32xf32>
    %241 = arith.addf %240, %28 : vector<1x32xf32>
    %cst_75 = arith.constant dense<0.000000e+00> : vector<1x32xf32>
    %242 = tpu.matmul %236, %26, %cst_75 {dimension_numbers = #tpu.dot_dimension_numbers<[1], [0], [0], [1], [0, 0, 1, 1], [], []>} : vector<1x32xf32>, vector<32x32xf32>, vector<1x32xf32> -> vector<1x32xf32>
    %243 = arith.addf %242, %29 : vector<1x32xf32>
    %244 = vector.extract_strided_slice %8 {offsets = [7, 0], sizes = [1, 32], strides = [1, 1]} : vector<8x32xf32> to vector<1x32xf32>
    %245 = arith.addf %244, %239 : vector<1x32xf32>
    %246 = arith.negf %245 : vector<1x32xf32>
    %247 = math.exp %246 : vector<1x32xf32>
    %cst_76 = arith.constant 1.000000e+00 : f32
    %248 = vector.broadcast %cst_76 : f32 to vector<1x32xf32>
    %249 = arith.addf %248, %247 : vector<1x32xf32>
    %250 = arith.divf %248, %249 : vector<1x32xf32>
    %251 = vector.extract_strided_slice %14 {offsets = [7, 0], sizes = [1, 32], strides = [1, 1]} : vector<8x32xf32> to vector<1x32xf32>
    %252 = arith.addf %251, %241 : vector<1x32xf32>
    %253 = arith.negf %252 : vector<1x32xf32>
    %254 = math.exp %253 : vector<1x32xf32>
    %cst_77 = arith.constant 1.000000e+00 : f32
    %255 = vector.broadcast %cst_77 : f32 to vector<1x32xf32>
    %256 = arith.addf %255, %254 : vector<1x32xf32>
    %257 = arith.divf %255, %256 : vector<1x32xf32>
    %258 = vector.extract_strided_slice %20 {offsets = [7, 0], sizes = [1, 32], strides = [1, 1]} : vector<8x32xf32> to vector<1x32xf32>
    %259 = arith.mulf %250, %243 : vector<1x32xf32>
    %260 = arith.addf %258, %259 : vector<1x32xf32>
    %261 = math.tanh %260 : vector<1x32xf32>
    %cst_78 = arith.constant 1.000000e+00 : f32
    %262 = vector.broadcast %cst_78 : f32 to vector<1x32xf32>
    %263 = arith.subf %262, %257 : vector<1x32xf32>
    %264 = arith.mulf %263, %261 : vector<1x32xf32>
    %265 = arith.mulf %257, %236 : vector<1x32xf32>
    %266 = arith.addf %264, %265 : vector<1x32xf32>
    %c4 = arith.constant 4 : index
    %c0_79 = arith.constant 0 : index
    %267 = vector.load %arg15[%c4, %c0_79] : memref<5x32xf32, #tpu.memory_space<vmem>>, vector<1x32xf32>
    tpu.vector_store %arg15[%c4, %c0_79], %266 {strides = array<i32>} : memref<5x32xf32, #tpu.memory_space<vmem>>, vector<1x32xf32>,
    %c0_80 = arith.constant 0 : index
    %c0_81 = arith.constant 0 : index
    %268 = vector.load %arg15[%c0_80, %c0_81] : memref<5x32xf32, #tpu.memory_space<vmem>>, vector<5x32xf32>
    %c0_82 = arith.constant 0 : index
    %c0_83 = arith.constant 0 : index
    %269 = vector.load %arg2[%c0_82, %c0_83] : memref<6x64xf32, #tpu.memory_space<vmem>>, vector<6x64xf32>
    %c0_84 = arith.constant 0 : index
    %c0_85 = arith.constant 0 : index
    %270 = vector.load %arg7[%c0_84, %c0_85] : memref<64x32xf32, #tpu.memory_space<vmem>>, vector<64x32xf32>
    %cst_86 = arith.constant dense<0.000000e+00> : vector<6x32xf32>
    %271 = tpu.matmul %269, %270, %cst_86 {dimension_numbers = #tpu.dot_dimension_numbers<[1], [0], [0], [1], [0, 0, 1, 1], [], []>} : vector<6x64xf32>, vector<64x32xf32>, vector<6x32xf32> -> vector<6x32xf32>
    %c0_87 = arith.constant 0 : index
    %c0_88 = arith.constant 0 : index
    %272 = vector.load %arg8[%c0_87, %c0_88] : memref<1x32xf32, #tpu.memory_space<vmem>>, vector<1x32xf32>
    %273 = vector.broadcast %272 : vector<1x32xf32> to vector<6x32xf32>
    %274 = arith.addf %271, %273 : vector<6x32xf32>
    %275 = math.tanh %274 : vector<6x32xf32>
    %cst_89 = arith.constant dense<0.000000e+00> : vector<5x6xf32>
    %276 = tpu.matmul %268, %275, %cst_89 {dimension_numbers = #tpu.dot_dimension_numbers<[1], [1], [0], [0], [0, 0, 1, 0], [], []>} : vector<5x32xf32>, vector<6x32xf32>, vector<5x6xf32> -> vector<5x6xf32>
    %cst_90 = arith.constant dense<0xFF800000> : vector<5xf32>
    %277 = vector.multi_reduction <maximumf>, %276, %cst_90 [1] : vector<5x6xf32> to vector<5xf32>
    %278 = vector.shape_cast %277 : vector<5xf32> to vector<5x1xf32>
    %279 = vector.broadcast %278 : vector<5x1xf32> to vector<5x6xf32>
    %280 = arith.subf %276, %279 : vector<5x6xf32>
    %281 = math.exp %280 : vector<5x6xf32>
    %cst_91 = arith.constant dense<0.000000e+00> : vector<5xf32>
    %282 = vector.multi_reduction <add>, %281, %cst_91 [1] : vector<5x6xf32> to vector<5xf32>
    %283 = vector.shape_cast %282 : vector<5xf32> to vector<5x1xf32>
    %284 = vector.broadcast %283 : vector<5x1xf32> to vector<5x6xf32>
    %285 = arith.divf %281, %284 : vector<5x6xf32>
    %cst_92 = arith.constant dense<0.000000e+00> : vector<5x32xf32>
    %286 = tpu.matmul %285, %275, %cst_92 {dimension_numbers = #tpu.dot_dimension_numbers<[1], [0], [0], [1], [0, 0, 1, 1], [], []>} : vector<5x6xf32>, vector<6x32xf32>, vector<5x32xf32> -> vector<5x32xf32>
    %c0_93 = arith.constant 0 : index
    %c0_94 = arith.constant 0 : index
    %287 = vector.load %arg10[%c0_93, %c0_94] : memref<32x128xf32, #tpu.memory_space<vmem>>, vector<32x128xf32>
    %cst_95 = arith.constant dense<0.000000e+00> : vector<5x128xf32>
    %288 = tpu.matmul %268, %287, %cst_95 {dimension_numbers = #tpu.dot_dimension_numbers<[1], [0], [0], [1], [0, 0, 1, 1], [], []>} : vector<5x32xf32>, vector<32x128xf32>, vector<5x128xf32> -> vector<5x128xf32>
    %c0_96 = arith.constant 0 : index
    %c0_97 = arith.constant 0 : index
    %289 = vector.load %arg11[%c0_96, %c0_97] : memref<32x128xf32, #tpu.memory_space<vmem>>, vector<32x128xf32>
    %cst_98 = arith.constant dense<0.000000e+00> : vector<5x128xf32>
    %290 = tpu.matmul %286, %289, %cst_98 {dimension_numbers = #tpu.dot_dimension_numbers<[1], [0], [0], [1], [0, 0, 1, 1], [], []>} : vector<5x32xf32>, vector<32x128xf32>, vector<5x128xf32> -> vector<5x128xf32>
    %291 = arith.addf %288, %290 : vector<5x128xf32>
    %c0_99 = arith.constant 0 : index
    %c0_100 = arith.constant 0 : index
    %292 = vector.load %arg9[%c0_99, %c0_100] : memref<1x16xf32, #tpu.memory_space<vmem>>, vector<1x16xf32>
    %c0_101 = arith.constant 0 : index
    %c0_102 = arith.constant 0 : index
    %293 = vector.load %arg12[%c0_101, %c0_102] : memref<16x128xf32, #tpu.memory_space<vmem>>, vector<16x128xf32>
    %cst_103 = arith.constant dense<0.000000e+00> : vector<1x128xf32>
    %294 = tpu.matmul %292, %293, %cst_103 {dimension_numbers = #tpu.dot_dimension_numbers<[1], [0], [0], [1], [0, 0, 1, 1], [], []>} : vector<1x16xf32>, vector<16x128xf32>, vector<1x128xf32> -> vector<1x128xf32>
    %295 = vector.broadcast %294 : vector<1x128xf32> to vector<5x128xf32>
    %296 = arith.addf %291, %295 : vector<5x128xf32>
    %c0_104 = arith.constant 0 : index
    %c0_105 = arith.constant 0 : index
    %297 = vector.load %arg13[%c0_104, %c0_105] : memref<1x128xf32, #tpu.memory_space<vmem>>, vector<1x128xf32>
    %298 = vector.broadcast %297 : vector<1x128xf32> to vector<5x128xf32>
    %299 = arith.addf %296, %298 : vector<5x128xf32>
    %cst_106 = arith.constant dense<0xFF800000> : vector<5xf32>
    %300 = vector.multi_reduction <maximumf>, %299, %cst_106 [1] : vector<5x128xf32> to vector<5xf32>
    %301 = vector.shape_cast %300 : vector<5xf32> to vector<5x1xf32>
    %302 = vector.broadcast %301 : vector<5x1xf32> to vector<5x128xf32>
    %303 = arith.subf %299, %302 : vector<5x128xf32>
    %304 = math.exp %303 : vector<5x128xf32>
    %cst_107 = arith.constant dense<0.000000e+00> : vector<5xf32>
    %305 = vector.multi_reduction <add>, %304, %cst_107 [1] : vector<5x128xf32> to vector<5xf32>
    %306 = vector.shape_cast %305 : vector<5xf32> to vector<5x1xf32>
    %307 = math.log %306 : vector<5x1xf32>
    %308 = arith.addf %307, %301 : vector<5x1xf32>
    %309 = vector.broadcast %308 : vector<5x1xf32> to vector<5x128xf32>
    %310 = arith.subf %299, %309 : vector<5x128xf32>
    %c0_108 = arith.constant 0 : index
    %c0_109 = arith.constant 0 : index
    %311 = vector.load %arg14[%c0_108, %c0_109] : memref<5x128xf32, #tpu.memory_space<vmem>>, vector<5x128xf32>
    tpu.vector_store %arg14[%c0_108, %c0_109], %310 {strides = array<i32>} : memref<5x128xf32, #tpu.memory_space<vmem>>, vector<5x128xf32>,
    return
  }
  func.func @transform_0(%arg0: i32) -> (i32, i32) {
    %c0_i32 = arith.constant 0 : i32
    %c0_i32_0 = arith.constant 0 : i32
    %c0_i32_1 = arith.constant 0 : i32
    return %c0_i32, %c0_i32_0 : i32, i32
  }
  func.func @transform_1(%arg0: i32) -> (i32, i32) {
    %c0_i32 = arith.constant 0 : i32
    %c0_i32_0 = arith.constant 0 : i32
    %c0_i32_1 = arith.constant 0 : i32
    return %c0_i32, %c0_i32_0 : i32, i32
  }
  func.func @transform_2(%arg0: i32) -> (i32, i32, i32) {
    %c0_i32 = arith.constant 0 : i32
    %c0_i32_0 = arith.constant 0 : i32
    %c0_i32_1 = arith.constant 0 : i32
    %c0_i32_2 = arith.constant 0 : i32
    return %c0_i32, %c0_i32_0, %c0_i32_1 : i32, i32, i32
  }
  func.func @transform_3(%arg0: i32) -> (i32, i32, i32) {
    %c0_i32 = arith.constant 0 : i32
    %c0_i32_0 = arith.constant 0 : i32
    %c0_i32_1 = arith.constant 0 : i32
    %c0_i32_2 = arith.constant 0 : i32
    return %c0_i32, %c0_i32_0, %c0_i32_1 : i32, i32, i32
  }
  func.func @transform_4(%arg0: i32) -> (i32, i32) {
    %c0_i32 = arith.constant 0 : i32
    %c0_i32_0 = arith.constant 0 : i32
    %c0_i32_1 = arith.constant 0 : i32
    return %c0_i32, %c0_i32_0 : i32, i32
  }
  func.func @transform_5(%arg0: i32) -> (i32, i32) {
    %c0_i32 = arith.constant 0 : i32
    %c0_i32_0 = arith.constant 0 : i32
    %c0_i32_1 = arith.constant 0 : i32
    return %c0_i32, %c0_i32_0 : i32, i32
  }
  func.func @transform_6(%arg0: i32) -> (i32, i32) {
    %c0_i32 = arith.constant 0 : i32
    %c0_i32_0 = arith.constant 0 : i32
    %c0_i32_1 = arith.constant 0 : i32
    return %c0_i32, %c0_i32_0 : i32, i32
  }
  func.func @transform_7(%arg0: i32) -> (i32, i32) {
    %c0_i32 = arith.constant 0 : i32
    %c0_i32_0 = arith.constant 0 : i32
    %c0_i32_1 = arith.constant 0 : i32
    return %c0_i32, %c0_i32_0 : i32, i32
  }
  func.func @transform_8(%arg0: i32) -> (i32, i32) {
    %c0_i32 = arith.constant 0 : i32
    %c0_i32_0 = arith.constant 0 : i32
    %c0_i32_1 = arith.constant 0 : i32
    return %c0_i32, %c0_i32_0 : i32, i32
  }
  func.func @transform_9(%arg0: i32) -> (i32, i32) {
    %c0_i32 = arith.constant 0 : i32
    %c0_i32_0 = arith.constant 0 : i32
    %c0_i32_1 = arith.constant 0 : i32
    return %c0_i32, %c0_i32_0 : i32, i32
  }
  func.func @transform_10(%arg0: i32) -> (i32, i32) {
    %c0_i32 = arith.constant 0 : i32
    %c0_i32_0 = arith.constant 0 : i32
    %c0_i32_1 = arith.constant 0 : i32
    return %c0_i32, %c0_i32_0 : i32, i32
  }
  func.func @transform_11(%arg0: i32) -> (i32, i32) {
    %c0_i32 = arith.constant 0 : i32
    %c0_i32_0 = arith.constant 0 : i32
    %c0_i32_1 = arith.constant 0 : i32
    return %c0_i32, %c0_i32_0 : i32, i32
  }
  func.func @transform_12(%arg0: i32) -> (i32, i32) {
    %c0_i32 = arith.constant 0 : i32
    %c0_i32_0 = arith.constant 0 : i32
    %c0_i32_1 = arith.constant 0 : i32
    return %c0_i32, %c0_i32_0 : i32, i32
  }
  func.func @transform_13(%arg0: i32) -> (i32, i32) {
    %c0_i32 = arith.constant 0 : i32
    %c0_i32_0 = arith.constant 0 : i32
    %c0_i32_1 = arith.constant 0 : i32
    return %c0_i32, %c0_i32_0 : i32, i32
  }
}

</mosaic_0001>

<bundles_post_ra>
// kernel: tpu_custom_call.1
= control target key start
LH: loop header
LB: loop body
LE: loop exit
PB: predicated region body
PF: predicated region fallthrough
CT: control target
= control target key end

     0   :  { %v1559_v14 = vmov 0.0   ;;  %vm57_vm0 = vcmask 523264   ;;  %s2064_s0 = inlined_call_operand.vmem [shape: f32[8,64], index: 0, kind: input, shape index: {}]   ;;  %s2065_s1 = inlined_call_operand.vmem [shape: f32[6,64], index: 1, kind: input, shape index: {}]   ;;  %s2066_s2 = inlined_call_operand.vmem [shape: f32[3,64,32], index: 2, kind: input, shape index: {}]   ;;  %s2067_s3 = inlined_call_operand.vmem [shape: f32[3,32,32], index: 3, kind: input, shape index: {}]   ;;  %s2068_s4 = inlined_call_operand.vmem [shape: f32[3,32], index: 4, kind: input, shape index: {}]   ;;  %s2069_s5 = inlined_call_operand.vmem [shape: f32[3,32], index: 5, kind: input, shape index: {}]   ;;  %s2070_s6 = inlined_call_operand.vmem [shape: f32[64,32], index: 6, kind: input, shape index: {}]   ;;  %s2071_s7 = inlined_call_operand.vmem [shape: f32[1,32], index: 7, kind: input, shape index: {}]   ;;  %s2072_s8 = inlined_call_operand.vmem [shape: f32[1,16], index: 8, kind: input, shape index: {}]   ;;  %s2073_s9 = inlined_call_operand.vmem [shape: f32[32,128], index: 9, kind: input, shape index: {}]   ;;  %s2074_s10 = inlined_call_operand.vmem [shape: f32[32,128], index: 10, kind: input, shape index: {}]   ;;  %s2075_s11 = inlined_call_operand.vmem [shape: f32[16,128], index: 11, kind: input, shape index: {}]   ;;  %s2076_s12 = inlined_call_operand.vmem [shape: f32[1,128], index: 12, kind: input, shape index: {}]   ;;  %s2077_s13 = inlined_call_operand.hbm [shape: f32[5,128], index: 13, kind: output, shape index: {}]  }
   0x1   :  { %v55_v0 = vld [vmem:[%s2066_s2 + $0x38] sm:$0xff]  ;;  %v54_v2 = vld [vmem:[%s2066_s2 + $0x30] sm:$0xff]  ;;  %v53_v4 = vld [vmem:[%s2066_s2 + $0x28] sm:$0xff] }
   0x2   :  { %v1637_v1 = vld [vmem:[%s2067_s3 + $0x18] sm:$0xff]  ;;  %69 = vmatpush.msra.mxu0 %v55_v0  ;;  %v1646_v3 = vld [vmem:[%s2067_s3 + $0x10] sm:$0xff]  ;;  %v1654_v5 = vld [vmem:[%s2067_s3 + $0x8] sm:$0xff] }
   0x3   :  { %171 = vmatpush.msra.mxu3 %v1637_v1  ;;  %v1374_v6 = vld [vmem:[%s2066_s2 + $0x78] sm:$0xff]  ;;  %v1373_v7 = vld [vmem:[%s2066_s2 + $0x70] sm:$0xff]  ;;  %v52_v8 = vld [vmem:[%s2066_s2 + $0x20] sm:$0xff] }
   0x4   :  { %70 = vmatpush.msra.mxu0 %v54_v2  ;;  %99 = vmatpush.msra.mxu1 %v1374_v6  ;;  %v1669_v9 = vld [vmem:[%s2067_s3] sm:$0xff]  ;;  %v1372_v10 = vld [vmem:[%s2066_s2 + $0x68] sm:$0xff]  ;;  %v51_v11 = vld [vmem:[%s2066_s2 + $0x18] sm:$0xff] }
   0x5   :  { %172 = vmatpush.msra.mxu3 %v1646_v3  ;;  %v1681_v12 = vld [vmem:[%s2067_s3 + $0x38] sm:$0xff]  ;;  %v1371_v13 = vld [vmem:[%s2066_s2 + $0x60] sm:$0xff]  ;;  %v50_v15 = vld [vmem:[%s2066_s2 + $0x10] sm:$0xff] }
   0x6   :  { %71 = vmatpush.msra.mxu0 %v53_v4  ;;  %100 = vmatpush.msra.mxu1 %v1373_v7  ;;  %v1693_v16 = vld [vmem:[%s2067_s3 + $0x30] sm:$0xff]  ;;  %v1383_v17 = vld [vmem:[%s2066_s2 + $0xb8] sm:$0xff]  ;;  %v49_v20 = vld [vmem:[%s2066_s2 + $0x8] sm:$0xff] }
   0x7   :  { %173 = vmatpush.msra.mxu3 %v1654_v5  ;;  %v1370_v18 = vld [vmem:[%s2066_s2 + $0x58] sm:$0xff]  ;;  %v1382_v19 = vld [vmem:[%s2066_s2 + $0xb0] sm:$0xff]  ;;  %v1711_v21 = vld [vmem:[%s2067_s3 + $0x28] sm:$0xff]  ;;  %129 = vmatpush.msra.mxu2 %v1383_v17 }
   0x8   :  { %72 = vmatpush.msra.mxu0 %v52_v8  ;;  %101 = vmatpush.msra.mxu1 %v1372_v10  ;;  %v1369_v22 = vld [vmem:[%s2066_s2 + $0x50] sm:$0xff]  ;;  %v1381_v23 = vld [vmem:[%s2066_s2 + $0xa8] sm:$0xff]  ;;  %v48_v24 = vld [vmem:[%s2066_s2] sm:$0xff] }
   0x9   :  { %174 = vmatpush.msra.mxu3 %v1669_v9  ;;  %v1726_v25 = vld [vmem:[%s2067_s3 + $0x20] sm:$0xff]  ;;  %130 = vmatpush.msra.mxu2 %v1382_v19 }
   0xa   :  { %175 = vmatmul.f32.vlgmr.msra.gmra.mxu3 %v1559_v14  ;;  %73 = vmatpush.msra.mxu0 %v51_v11  ;;  %v45_v26 = vld [vmem:[%s2064_s0] sm:$0xff] }
   0xb   :  { %194 = vmatpush.msrb.mxu3 %v1681_v12  ;;  %102 = vmatpush.msra.mxu1 %v1371_v13 }
   0xc   :  { %74 = vmatpush.msra.mxu0 %v50_v15 }
   0xd   :  { %195 = vmatpush.msrb.mxu3 %v1693_v16  ;;  %103 = vmatpush.msra.mxu1 %v1370_v18 }
   0xe   :  { %75 = vmatpush.msra.mxu0 %v49_v20 }
   0xf   :  { %196 = vmatpush.msrb.mxu3 %v1711_v21 }
  0x10   :  { %18 = vsyncpa [#allocation4], 0  ;;  %104 = vmatpush.msra.mxu1 %v1369_v22  ;;  %v1368_v27 = vld [vmem:[%s2066_s2 + $0x48] sm:$0xff]  ;;  %131 = vmatpush.msra.mxu2 %v1381_v23  ;;  %v1380_v28 = vld [vmem:[%s2066_s2 + $0xa0] sm:$0xff]  ;;  %vm155_vm9 = vcmask 261120  }
  0x11   :  { %76 = vmatpush.msra.mxu0 %v48_v24  ;;  %197 = vmatpush.msrb.mxu3 %v1726_v25  ;;  %v1742_v29 = vld [vmem:[%s2067_s3 + $0x58] sm:$0xff]  ;;  %v1367_v30 = vld [vmem:[%s2066_s2 + $0x40] sm:$0xff]  ;;  %v1754_v32 = vld [vmem:[%s2067_s3 + $0x50] sm:$0xff] }
  0x12   :  { %1366 = vmatmul.msk.f32.vlgmr.msra.gmra.mxu0 %vm57_vm0, %v45_v26  ;;  %198 = vmatmul.f32.vlgmr.msrb.gmra.mxu3 %v1559_v14  ;;  %v1379_v31 = vld [vmem:[%s2066_s2 + $0x98] sm:$0xff]  ;;  %v1378_v33 = vld [vmem:[%s2066_s2 + $0x90] sm:$0xff]  ;;  %v1764_v34 = vld [vmem:[%s2067_s3 + $0x48] sm:$0xff] }
  0x13   :  { %105 = vmatpush.msra.mxu1 %v1368_v27  ;;  %132 = vmatpush.msra.mxu2 %v1380_v28  ;;  %v1377_v35 = vld [vmem:[%s2066_s2 + $0x88] sm:$0xff]  ;;  %v1774_v36 = vld [vmem:[%s2067_s3 + $0x40] sm:$0xff]  ;;  %s1357_s3 = sshll.u32 %s2077_s13, 4  ;;  %s1358_s3 = int_to_ptr.hbm [resolvable:$true] %s1357_s3 }
  0x14   :  { %216 = vmatpush.msrb.mxu0 %v1742_v29  ;;  %326 = vmatpush.msra.mxu3 %v1742_v29  ;;  %v1376_v37 = vld [vmem:[%s2066_s2 + $0x80] sm:$0xff] }
  0x15   :  { %106 = vmatpush.msra.mxu1 %v1367_v30  ;;  %133 = vmatpush.msra.mxu2 %v1379_v31  ;;  %v46_v38 = vld [vmem:[%s2068_s4] sm:$0x7] }
  0x16   :  { %1375 = vmatmul.msk.f32.vlgmr.msra.gmra.mxu1 %vm57_vm0, %v45_v26  ;;  %217 = vmatpush.msrb.mxu0 %v1754_v32  ;;  %v1819_v39 = vld [vmem:[%s2069_s5] sm:$0x7]  ;;  %v56_v40 = vperm.slane %v46_v38, 0  ;;  %v90_v45 = vperm.slane %v46_v38, 1  ;;  %v120_v6 = vperm.slane %v46_v38, 2 }
  0x17   :  { %134 = vmatpush.msra.mxu2 %v1378_v33  ;;  %286 = vmatpush.msrb.mxu1 %v1637_v1  ;;  %v1825_v46 = vrot.slane %v1819_v39, 1  ;;  %v1833_v61 = vrot.slane %v1819_v39, 2 }
  0x18   :  { %218 = vmatpush.msrb.mxu0 %v1764_v34  ;;  %327 = vmatpush.msra.mxu3 %v1754_v32 }
  0x19   :  { %135 = vmatpush.msra.mxu2 %v1377_v35  ;;  %287 = vmatpush.msrb.mxu1 %v1646_v3 }
  0x1a   :  { %219 = vmatpush.msrb.mxu0 %v1774_v36  ;;  %328 = vmatpush.msra.mxu3 %v1764_v34 }
  0x1b   :  { %136 = vmatpush.msra.mxu2 %v1376_v37  ;;  %220 = vmatmul.f32.vlgmr.msrb.gmra.mxu0 %v1559_v14 }
  0x1c   :  { %1384 = vmatmul.msk.f32.vlgmr.msra.gmra.mxu2 %vm57_vm0, %v45_v26  ;;  %288 = vmatpush.msrb.mxu1 %v1654_v5 }
  0x1d   :  { %306 = vmatpush.msrb.mxu2 %v1681_v12  ;;  %329 = vmatpush.msra.mxu3 %v1774_v36 }
  0x1e   :  { %289 = vmatpush.msrb.mxu1 %v1669_v9  ;;  %408 = vmatpush.msra.mxu0 %v1637_v1 }
  0x1f   :  { %307 = vmatpush.msrb.mxu2 %v1693_v16  ;;  %530 = vmatpush.msrb.mxu3 %v1637_v1 }
  0x20   :  { %428 = vmatpush.msra.mxu1 %v1681_v12  ;;  %409 = vmatpush.msra.mxu0 %v1646_v3 }
  0x21   :  { %308 = vmatpush.msrb.mxu2 %v1711_v21  ;;  %531 = vmatpush.msrb.mxu3 %v1646_v3 }
  0x22   :  { %429 = vmatpush.msra.mxu1 %v1693_v16  ;;  %410 = vmatpush.msra.mxu0 %v1654_v5 }
  0x23   :  { %309 = vmatpush.msrb.mxu2 %v1726_v25  ;;  %532 = vmatpush.msrb.mxu3 %v1654_v5 }
  0x24   :  { %430 = vmatpush.msra.mxu1 %v1711_v21  ;;  %411 = vmatpush.msra.mxu0 %v1669_v9 }
  0x25   :  { %448 = vmatpush.msra.mxu2 %v1742_v29  ;;  %533 = vmatpush.msrb.mxu3 %v1669_v9 }
  0x26   :  { %431 = vmatpush.msra.mxu1 %v1726_v25  ;;  %550 = vmatpush.msrb.mxu0 %v1681_v12 }
  0x27   :  { %449 = vmatpush.msra.mxu2 %v1754_v32 }
  0x28   :  { %551 = vmatpush.msrb.mxu0 %v1693_v16 }
  0x29   :  { %450 = vmatpush.msra.mxu2 %v1764_v34 }
  0x2a   :  { %552 = vmatpush.msrb.mxu0 %v1711_v21 }
  0x2b   :  { %451 = vmatpush.msra.mxu2 %v1774_v36 }
  0x2c   :  { %553 = vmatpush.msrb.mxu0 %v1726_v25 }
  0x8d   :  { %v176_v41 = vpop.f32.mrf.mxu3 }
  0x8e   :  { %v177_v42 = vadd.f32 %v176_v41, %v1819_v39 }
  0x8f   :  { %v78_v43 = vpop.f32.mrf.mxu0 }
  0x90   :  { %v1822_v44 = vadd.f32 %v78_v43, %v56_v40 }
  0x92   :  { %v224_v47 = vadd.f32 %v177_v42, %v1822_v44 }
  0x93   :  { %v108_v48 = vpop.f32.mrf.mxu1 }
  0x94   :  { %v1828_v49 = vadd.f32 %v108_v48, %v90_v45  ;;  %v1393_v50 = vmul.f32 -1.442695, %v224_v47 }
  0x95   :  { %v199_v51 = vpop.f32.mrf.mxu3 }
  0x96   :  { %v200_v52 = vadd.f32 %v199_v51, %v1825_v46  ;;  %1442 = vpow2.f32 %v1393_v50 }
  0x98   :  { %v244_v53 = vadd.f32 %v200_v52, %v1828_v49  ;;  %v221_v63 = vpop.f32.mrf.mxu0 }
  0x99   :  { %v222_v11 = vadd.f32 %v221_v63, %v1833_v61 }
  0x9a   :  { %v1394_v54 = vmul.f32 -1.442695, %v244_v53 }
  0x9c   :  { %v1443_v55 = vpop.eup %1442  ;;  %1444 = vpow2.f32 %v1394_v54 }
  0x9d   :  { %v228_v56 = vadd.f32 1.0, %v1443_v55 }
  0x9f   :  { %1446 = vrcp.f32 %v228_v56  ;;  %v240_v0 = vand.u32 2147483648, %v228_v56  ;;  %v238_v4 = vand.u32 2147483647, %v228_v56  ;;  %v138_v8 = vpop.f32.mrf.mxu2  ;;  %vm234_vm2 = vweird.f32 %v228_v56 }
  0xa0   :  { %v1836_v18 = vadd.f32 %v138_v8, %v120_v6 }
  0xa1   :  { %v241_v14 = vor.u32 1.1754944e-38, %v240_v0  ;;  %vm239_vm4 = vcmp.eq.f32.partialorder %v238_v4, 8.507059e+37 }
  0xa2   :  { %v1445_v57 = vpop.eup %1444 }
  0xa3   :  { %v248_v58 = vadd.f32 1.0, %v1445_v57 }
  0xa5   :  { %v1447_v59 = vpop.eup %1446  ;;  %1448 = vrcp.f32 %v248_v58  ;;  %v260_v23 = vand.u32 2147483648, %v248_v58  ;;  %v258_v24 = vand.u32 2147483647, %v248_v58  ;;  %vm254_vm6 = vweird.f32 %v248_v58 }
  0xa6   :  { %v230_v60 = vmul.f32 %v1447_v59, %v228_v56  ;;  %vm235_vm1 = vweird.f32 %v1447_v59 }
  0xa7   :  { %vm236_vm3 = vmor %vm234_vm2, %vm235_vm1  ;;  %v261_v30 = vor.u32 1.1754944e-38, %v260_v23  ;;  %vm259_vm8 = vcmp.eq.f32.partialorder %v258_v24, 8.507059e+37 }
  0xa8   :  { %v231_v62 = vsub.f32 1.0, %v230_v60 }
  0xaa   :  { %v232_v2 = vmul.f32 %v1447_v59, %v231_v62 }
  0xab   :  { %v1449_v7 = vpop.eup %1448 }
  0xac   :  { %v250_v10 = vmul.f32 %v1449_v7, %v248_v58  ;;  %v233_v13 = vadd.f32 %v1447_v59, %v232_v2  ;;  %vm255_vm5 = vweird.f32 %v1449_v7 }
  0xad   :  { %vm256_vm7 = vmor %vm254_vm6, %vm255_vm5 }
  0xae   :  { %v251_v15 = vsub.f32 1.0, %v250_v10  ;;  %v237_v17 = vsel %vm236_vm3, %v1447_v59, %v233_v13 }
  0xaf   :  { %v242_v19 = vsel %vm239_vm4, %v241_v14, %v237_v17 }
  0xb0   :  { %v264_v20 = vmul.f32 %v242_v19, %v222_v11  ;;  %v252_v22 = vmul.f32 %v1449_v7, %v251_v15 }
  0xb2   :  { %v253_v26 = vadd.f32 %v1449_v7, %v252_v22  ;;  %v265_v27 = vadd.f32 %v264_v20, %v1836_v18 }
  0xb4   :  { %v257_v28 = vsel %vm256_vm7, %v1449_v7, %v253_v26  ;;  %1450 = vtanh.f32 %v265_v27 }
  0xb5   :  { %v262_v31 = vsel %vm259_vm8, %v261_v30, %v257_v28 }
  0xb6   :  { %v267_v33 = vsub.f32 1.0, %v262_v31  ;;  %v269_v38 = vmul.f32 0.0, %v262_v31 }
  0xba   :  { %v1451_v35 = vpop.eup %1450 }
  0xbb   :  { %v268_v37 = vmul.f32 %v1451_v35, %v267_v33 }
  0xbd   :  { %v1839_v40 = vadd.f32 %v269_v38, %v268_v37 }
  0xbf   :  { %1395 = vmatmul.msk.f32.vlgmr.msrb.gmra.mxu1 %vm155_vm9, %v1839_v40  ;;  %1396 = vmatmul.msk.f32.vlgmr.msrb.gmra.mxu2 %vm155_vm9, %v1839_v40  ;;  %v388_v30 = vrot.slane %v1839_v40, 7 }
  0xc0   :  { %1397 = vmatmul.msk.f32.vlgmr.msra.gmra.mxu3 %vm155_vm9, %v1839_v40  ;;  %570 = vmatpush.msrb.mxu1 %v1742_v29 }
  0xc1   :  { %654 = vmatpush.msrb.mxu2 %v1637_v1  ;;  %674 = vmatpush.msra.mxu3 %v1681_v12 }
  0xc2   :  { %571 = vmatpush.msrb.mxu1 %v1754_v32 }
  0xc3   :  { %655 = vmatpush.msrb.mxu2 %v1646_v3  ;;  %675 = vmatpush.msra.mxu3 %v1693_v16 }
  0xc4   :  { %572 = vmatpush.msrb.mxu1 %v1764_v34 }
  0xc5   :  { %656 = vmatpush.msrb.mxu2 %v1654_v5  ;;  %676 = vmatpush.msra.mxu3 %v1711_v21 }
  0xc6   :  { %573 = vmatpush.msrb.mxu1 %v1774_v36 }
  0xc7   :  { %657 = vmatpush.msrb.mxu2 %v1669_v9  ;;  %677 = vmatpush.msra.mxu3 %v1726_v25 }
 0x13c   :  { %v291_v41 = vpop.f32.mrf.mxu1 }
 0x13d   :  { %v292_v42 = vadd.f32 %v291_v41, %v1819_v39 }
 0x13f   :  { %v335_v43 = vrot.slane %v292_v42, 7 }
 0x141   :  { %v337_v45 = vadd.f32 %v335_v43, %v1822_v44 }
 0x142   :  { %v311_v47 = vpop.f32.mrf.mxu2 }
 0x143   :  { %v1398_v48 = vmul.f32 -1.442695, %v337_v45  ;;  %v312_v50 = vadd.f32 %v311_v47, %v1825_v46  ;;  %v331_v60 = vpop.f32.mrf.mxu3 }
 0x144   :  { %v332_v0 = vadd.f32 %v331_v60, %v1833_v61 }
 0x145   :  { %1452 = vpow2.f32 %v1398_v48  ;;  %v358_v51 = vrot.slane %v312_v50, 7 }
 0x146   :  { %v381_v14 = vrot.slane %v332_v0, 7 }
 0x147   :  { %v360_v52 = vadd.f32 %v358_v51, %v1828_v49 }
 0x149   :  { %v1399_v53 = vmul.f32 -1.442695, %v360_v52 }
 0x14b   :  { %v1453_v54 = vpop.eup %1452  ;;  %1454 = vpow2.f32 %v1399_v53 }
 0x14c   :  { %v341_v55 = vadd.f32 1.0, %v1453_v54 }
 0x14e   :  { %1456 = vrcp.f32 %v341_v55  ;;  %v353_v63 = vand.u32 2147483648, %v341_v55  ;;  %v351_v4 = vand.u32 2147483647, %v341_v55  ;;  %vm347_vm11 = vweird.f32 %v341_v55 }
 0x150   :  { %v354_v10 = vor.u32 1.1754944e-38, %v353_v63  ;;  %vm352_vm13 = vcmp.eq.f32.partialorder %v351_v4, 8.507059e+37 }
 0x151   :  { %v1455_v56 = vpop.eup %1454 }
 0x152   :  { %v364_v57 = vadd.f32 1.0, %v1455_v56 }
 0x154   :  { %v1457_v58 = vpop.eup %1456  ;;  %1458 = vrcp.f32 %v364_v57  ;;  %v376_v19 = vand.u32 2147483648, %v364_v57  ;;  %v374_v22 = vand.u32 2147483647, %v364_v57  ;;  %vm370_vm15 = vweird.f32 %v364_v57 }
 0x155   :  { %v343_v59 = vmul.f32 %v1457_v58, %v341_v55  ;;  %vm348_vm10 = vweird.f32 %v1457_v58 }
 0x156   :  { %vm349_vm12 = vmor %vm347_vm11, %vm348_vm10  ;;  %v377_v26 = vor.u32 1.1754944e-38, %v376_v19  ;;  %vm375_vm2 = vcmp.eq.f32.partialorder %v374_v22, 8.507059e+37 }
 0x157   :  { %v344_v62 = vsub.f32 1.0, %v343_v59 }
 0x159   :  { %v345_v2 = vmul.f32 %v1457_v58, %v344_v62 }
 0x15a   :  { %v1459_v6 = vpop.eup %1458 }
 0x15b   :  { %v366_v7 = vmul.f32 %v1459_v6, %v364_v57  ;;  %v346_v8 = vadd.f32 %v1457_v58, %v345_v2  ;;  %vm371_vm14 = vweird.f32 %v1459_v6 }
 0x15c   :  { %vm372_vm1 = vmor %vm370_vm15, %vm371_vm14 }
 0x15d   :  { %v367_v11 = vsub.f32 1.0, %v366_v7  ;;  %v350_v13 = vsel %vm349_vm12, %v1457_v58, %v346_v8 }
 0x15e   :  { %v355_v15 = vsel %vm352_vm13, %v354_v10, %v350_v13 }
 0x15f   :  { %v368_v17 = vmul.f32 %v1459_v6, %v367_v11  ;;  %v383_v20 = vmul.f32 %v381_v14, %v355_v15 }
 0x161   :  { %v369_v23 = vadd.f32 %v1459_v6, %v368_v17  ;;  %v384_v24 = vadd.f32 %v383_v20, %v1836_v18 }
 0x163   :  { %v373_v27 = vsel %vm372_vm1, %v1459_v6, %v369_v23  ;;  %1460 = vtanh.f32 %v384_v24 }
 0x164   :  { %v378_v28 = vsel %vm375_vm2, %v377_v26, %v373_v27 }
 0x165   :  { %v386_v31 = vsub.f32 1.0, %v378_v28  ;;  %v390_v37 = vmul.f32 %v388_v30, %v378_v28 }
 0x169   :  { %v1461_v33 = vpop.eup %1460 }
 0x16a   :  { %v387_v35 = vmul.f32 %v1461_v33, %v386_v31 }
 0x16c   :  { %v1866_v38 = vadd.f32 %v390_v37, %v387_v35 }
 0x16e   :  { %v393_v41 = vrot.slane %v1866_v38, 1  ;;  %v510_v30 = vrot.slane %v1866_v38, 7 }
 0x170   :  { %1400 = vmatmul.msk.f32.vlgmr.msra.gmra.mxu0 %vm155_vm9, %v393_v41  ;;  %1401 = vmatmul.msk.f32.vlgmr.msra.gmra.mxu1 %vm155_vm9, %v393_v41 }
 0x171   :  { %1402 = vmatmul.msk.f32.vlgmr.msra.gmra.mxu2 %vm155_vm9, %v393_v41  ;;  %694 = vmatpush.msra.mxu0 %v1742_v29 }
 0x172   :  { %778 = vmatpush.msra.mxu1 %v1637_v1  ;;  %798 = vmatpush.msra.mxu2 %v1681_v12 }
 0x173   :  { %695 = vmatpush.msra.mxu0 %v1754_v32 }
 0x174   :  { %779 = vmatpush.msra.mxu1 %v1646_v3  ;;  %799 = vmatpush.msra.mxu2 %v1693_v16 }
 0x175   :  { %696 = vmatpush.msra.mxu0 %v1764_v34 }
 0x176   :  { %780 = vmatpush.msra.mxu1 %v1654_v5  ;;  %800 = vmatpush.msra.mxu2 %v1711_v21 }
 0x177   :  { %697 = vmatpush.msra.mxu0 %v1774_v36 }
 0x178   :  { %781 = vmatpush.msra.mxu1 %v1669_v9  ;;  %801 = vmatpush.msra.mxu2 %v1726_v25 }
 0x1ed   :  { %v413_v40 = vpop.f32.mrf.mxu0  ;;  %v433_v42 = vpop.f32.mrf.mxu1 }
 0x1ee   :  { %v414_v43 = vadd.f32 %v413_v40, %v1819_v39  ;;  %v434_v45 = vadd.f32 %v433_v42, %v1825_v46 }
 0x1f0   :  { %v457_v47 = vrot.slane %v414_v43, 6  ;;  %v480_v48 = vrot.slane %v434_v45, 6 }
 0x1f2   :  { %v459_v50 = vadd.f32 %v457_v47, %v1822_v44  ;;  %v482_v51 = vadd.f32 %v480_v48, %v1828_v49 }
 0x1f4   :  { %v1403_v52 = vmul.f32 -1.442695, %v459_v50  ;;  %v1404_v53 = vmul.f32 -1.442695, %v482_v51  ;;  %v453_v63 = vpop.f32.mrf.mxu2 }
 0x1f5   :  { %v454_v6 = vadd.f32 %v453_v63, %v1833_v61 }
 0x1f6   :  { %1462 = vpow2.f32 %v1403_v52 }
 0x1f7   :  { %1464 = vpow2.f32 %v1404_v53  ;;  %v503_v15 = vrot.slane %v454_v6, 6 }
 0x1fc   :  { %v1463_v54 = vpop.eup %1462 }
 0x1fd   :  { %v1465_v55 = vpop.eup %1464  ;;  %v463_v56 = vadd.f32 1.0, %v1463_v54 }
 0x1fe   :  { %v486_v57 = vadd.f32 1.0, %v1465_v55 }
 0x1ff   :  { %1466 = vrcp.f32 %v463_v56  ;;  %v475_v4 = vand.u32 2147483648, %v463_v56  ;;  %v473_v8 = vand.u32 2147483647, %v463_v56  ;;  %vm469_vm4 = vweird.f32 %v463_v56 }
 0x200   :  { %1468 = vrcp.f32 %v486_v57  ;;  %v498_v20 = vand.u32 2147483648, %v486_v57  ;;  %vm492_vm8 = vweird.f32 %v486_v57  ;;  %v496_v23 = vand.u32 2147483647, %v486_v57 }
 0x201   :  { %v476_v13 = vor.u32 1.1754944e-38, %v475_v4  ;;  %vm474_vm6 = vcmp.eq.f32.partialorder %v473_v8, 8.507059e+37 }
 0x202   :  { %v499_v27 = vor.u32 1.1754944e-38, %v498_v20  ;;  %vm497_vm11 = vcmp.eq.f32.partialorder %v496_v23, 8.507059e+37 }
 0x205   :  { %v1467_v58 = vpop.eup %1466 }
 0x206   :  { %v1469_v59 = vpop.eup %1468  ;;  %v465_v60 = vmul.f32 %v1467_v58, %v463_v56  ;;  %vm470_vm3 = vweird.f32 %v1467_v58 }
 0x207   :  { %v488_v62 = vmul.f32 %v1469_v59, %v486_v57  ;;  %vm471_vm5 = vmor %vm469_vm4, %vm470_vm3  ;;  %vm493_vm7 = vweird.f32 %v1469_v59 }
 0x208   :  { %v466_v0 = vsub.f32 1.0, %v465_v60  ;;  %vm494_vm10 = vmor %vm492_vm8, %vm493_vm7 }
 0x209   :  { %v489_v2 = vsub.f32 1.0, %v488_v62 }
 0x20a   :  { %v467_v7 = vmul.f32 %v1467_v58, %v466_v0 }
 0x20b   :  { %v490_v10 = vmul.f32 %v1469_v59, %v489_v2 }
 0x20c   :  { %v468_v11 = vadd.f32 %v1467_v58, %v467_v7 }
 0x20d   :  { %v491_v19 = vadd.f32 %v1469_v59, %v490_v10 }
 0x20e   :  { %v472_v14 = vsel %vm471_vm5, %v1467_v58, %v468_v11  ;;  %vm636_vm5 = vcmask 257027  }
 0x20f   :  { %v477_v17 = vsel %vm474_vm6, %v476_v13, %v472_v14  ;;  %v495_v26 = vsel %vm494_vm10, %v1469_v59, %v491_v19 }
 0x210   :  { %v505_v22 = vmul.f32 %v503_v15, %v477_v17  ;;  %v500_v28 = vsel %vm497_vm11, %v499_v27, %v495_v26 }
 0x211   :  { %v508_v31 = vsub.f32 1.0, %v500_v28  ;;  %v512_v37 = vmul.f32 %v510_v30, %v500_v28 }
 0x212   :  { %v506_v24 = vadd.f32 %v505_v22, %v1836_v18 }
 0x214   :  { %1470 = vtanh.f32 %v506_v24 }
 0x21a   :  { %v1471_v33 = vpop.eup %1470 }
 0x21b   :  { %v509_v35 = vmul.f32 %v1471_v33, %v508_v31 }
 0x21d   :  { %v1891_v41 = vadd.f32 %v512_v37, %v509_v35 }
 0x21f   :  { %v515_v40 = vrot.slane %v1891_v41, 2  ;;  %v632_v30 = vrot.slane %v1891_v41, 7 }
 0x221   :  { %1405 = vmatmul.msk.f32.vlgmr.msrb.gmra.mxu3 %vm155_vm9, %v515_v40  ;;  %1406 = vmatmul.msk.f32.vlgmr.msrb.gmra.mxu0 %vm155_vm9, %v515_v40 }
 0x222   :  { %1407 = vmatmul.msk.f32.vlgmr.msrb.gmra.mxu1 %vm155_vm9, %v515_v40  ;;  %818 = vmatpush.msrb.mxu3 %v1742_v29 }
 0x223   :  { %902 = vmatpush.msrb.mxu0 %v1637_v1  ;;  %922 = vmatpush.msrb.mxu1 %v1681_v12 }
 0x224   :  { %819 = vmatpush.msrb.mxu3 %v1754_v32 }
 0x225   :  { %903 = vmatpush.msrb.mxu0 %v1646_v3  ;;  %923 = vmatpush.msrb.mxu1 %v1693_v16 }
 0x226   :  { %820 = vmatpush.msrb.mxu3 %v1764_v34 }
 0x227   :  { %904 = vmatpush.msrb.mxu0 %v1654_v5  ;;  %924 = vmatpush.msrb.mxu1 %v1711_v21 }
 0x228   :  { %821 = vmatpush.msrb.mxu3 %v1774_v36 }
 0x229   :  { %905 = vmatpush.msrb.mxu0 %v1669_v9  ;;  %925 = vmatpush.msrb.mxu1 %v1726_v25 }
 0x29e   :  { %v555_v38 = vpop.f32.mrf.mxu0 }
 0x29f   :  { %v556_v42 = vadd.f32 %v555_v38, %v1825_v46  ;;  %v575_v0 = vpop.f32.mrf.mxu1 }
 0x2a0   :  { %v576_v6 = vadd.f32 %v575_v0, %v1833_v61 }
 0x2a1   :  { %v602_v43 = vrot.slane %v556_v42, 5 }
 0x2a2   :  { %v625_v14 = vrot.slane %v576_v6, 5 }
 0x2a3   :  { %v604_v45 = vadd.f32 %v602_v43, %v1828_v49 }
 0x2a4   :  { %v535_v47 = vpop.f32.mrf.mxu3 }
 0x2a5   :  { %v1409_v48 = vmul.f32 -1.442695, %v604_v45  ;;  %v536_v50 = vadd.f32 %v535_v47, %v1819_v39 }
 0x2a7   :  { %1472 = vpow2.f32 %v1409_v48  ;;  %v579_v51 = vrot.slane %v536_v50, 5 }
 0x2a9   :  { %v581_v52 = vadd.f32 %v579_v51, %v1822_v44 }
 0x2ab   :  { %v1408_v53 = vmul.f32 -1.442695, %v581_v52 }
 0x2ad   :  { %v1473_v54 = vpop.eup %1472  ;;  %1474 = vpow2.f32 %v1408_v53 }
 0x2ae   :  { %v608_v55 = vadd.f32 1.0, %v1473_v54 }
 0x2b0   :  { %1476 = vrcp.f32 %v608_v55  ;;  %v620_v20 = vand.u32 2147483648, %v608_v55  ;;  %vm614_vm2 = vweird.f32 %v608_v55  ;;  %v618_v23 = vand.u32 2147483647, %v608_v55 }
 0x2b2   :  { %v621_v27 = vor.u32 1.1754944e-38, %v620_v20  ;;  %vm619_vm4 = vcmp.eq.f32.partialorder %v618_v23, 8.507059e+37 }
 0x2b3   :  { %v1475_v56 = vpop.eup %1474 }
 0x2b4   :  { %v585_v57 = vadd.f32 1.0, %v1475_v56 }
 0x2b6   :  { %1478 = vrcp.f32 %v585_v57  ;;  %v1477_v58 = vpop.eup %1476  ;;  %v597_v4 = vand.u32 2147483648, %v585_v57  ;;  %v595_v8 = vand.u32 2147483647, %v585_v57  ;;  %vm591_vm13 = vweird.f32 %v585_v57 }
 0x2b7   :  { %v610_v59 = vmul.f32 %v1477_v58, %v608_v55  ;;  %vm615_vm1 = vweird.f32 %v1477_v58 }
 0x2b8   :  { %v598_v13 = vor.u32 1.1754944e-38, %v597_v4  ;;  %vm596_vm15 = vcmp.eq.f32.partialorder %v595_v8, 8.507059e+37  ;;  %vm616_vm3 = vmor %vm614_vm2, %vm615_vm1 }
 0x2b9   :  { %v611_v63 = vsub.f32 1.0, %v610_v59 }
 0x2bb   :  { %v612_v10 = vmul.f32 %v1477_v58, %v611_v63 }
 0x2bc   :  { %v1479_v60 = vpop.eup %1478 }
 0x2bd   :  { %v587_v62 = vmul.f32 %v1479_v60, %v585_v57  ;;  %vm592_vm12 = vweird.f32 %v1479_v60  ;;  %v613_v17 = vadd.f32 %v1477_v58, %v612_v10 }
 0x2be   :  { %vm593_vm14 = vmor %vm591_vm13, %vm592_vm12 }
 0x2bf   :  { %v588_v2 = vsub.f32 1.0, %v587_v62  ;;  %v617_v26 = vsel %vm616_vm3, %v1477_v58, %v613_v17 }
 0x2c0   :  { %v622_v28 = vsel %vm619_vm4, %v621_v27, %v617_v26 }
 0x2c1   :  { %v589_v7 = vmul.f32 %v1479_v60, %v588_v2  ;;  %v630_v31 = vsub.f32 1.0, %v622_v28  ;;  %v634_v37 = vmul.f32 %v632_v30, %v622_v28 }
 0x2c3   :  { %v590_v11 = vadd.f32 %v1479_v60, %v589_v7 }
 0x2c5   :  { %v594_v15 = vsel %vm593_vm14, %v1479_v60, %v590_v11 }
 0x2c6   :  { %v599_v19 = vsel %vm596_vm15, %v598_v13, %v594_v15  ;;  %vm760_vm15 = vcmask 258052  }
 0x2c7   :  { %v627_v22 = vmul.f32 %v625_v14, %v599_v19 }
 0x2c9   :  { %v628_v24 = vadd.f32 %v627_v22, %v1836_v18 }
 0x2cb   :  { %1480 = vtanh.f32 %v628_v24 }
 0x2d1   :  { %v1481_v33 = vpop.eup %1480 }
 0x2d2   :  { %v631_v35 = vmul.f32 %v1481_v33, %v630_v31 }
 0x2d4   :  { %v1916_v40 = vadd.f32 %v634_v37, %v631_v35 }
 0x2d6   :  { %637 = vst.msk [vmem:[#allocation2 - $0x3] sm:$0x8] %vm636_vm5, %v1916_v40  ;;  %v639_v38 = vrot.slane %v1916_v40, 3  ;;  %v756_v20 = vrot.slane %v1916_v40, 7 }
 0x2d8   :  { %1410 = vmatmul.msk.f32.vlgmr.msrb.gmra.mxu2 %vm155_vm9, %v639_v38  ;;  %1411 = vmatmul.msk.f32.vlgmr.msra.gmra.mxu3 %vm155_vm9, %v639_v38 }
 0x2d9   :  { %1412 = vmatmul.msk.f32.vlgmr.msra.gmra.mxu0 %vm155_vm9, %v639_v38  ;;  %942 = vmatpush.msrb.mxu2 %v1742_v29 }
 0x2da   :  { %1026 = vmatpush.msra.mxu3 %v1637_v1  ;;  %1046 = vmatpush.msra.mxu0 %v1681_v12 }
 0x2db   :  { %943 = vmatpush.msrb.mxu2 %v1754_v32 }
 0x2dc   :  { %1027 = vmatpush.msra.mxu3 %v1646_v3  ;;  %1047 = vmatpush.msra.mxu0 %v1693_v16 }
 0x2dd   :  { %944 = vmatpush.msrb.mxu2 %v1764_v34 }
 0x2de   :  { %1028 = vmatpush.msra.mxu3 %v1654_v5  ;;  %1048 = vmatpush.msra.mxu0 %v1711_v21 }
 0x2df   :  { %945 = vmatpush.msrb.mxu2 %v1774_v36 }
 0x2e0   :  { %1029 = vmatpush.msra.mxu3 %v1669_v9  ;;  %1049 = vmatpush.msra.mxu0 %v1726_v25 }
 0x356   :  { %v699_v53 = vpop.f32.mrf.mxu0 }
 0x357   :  { %v700_v58 = vadd.f32 %v699_v53, %v1833_v61 }
 0x359   :  { %v749_v2 = vrot.slane %v700_v58, 4 }
 0x35b   :  { %v659_v1 = vpop.f32.mrf.mxu2  ;;  %v679_v12 = vpop.f32.mrf.mxu3 }
 0x35c   :  { %v660_v41 = vadd.f32 %v659_v1, %v1819_v39  ;;  %v680_v3 = vadd.f32 %v679_v12, %v1825_v46 }
 0x35e   :  { %v703_v42 = vrot.slane %v660_v41, 4  ;;  %v726_v16 = vrot.slane %v680_v3, 4 }
 0x360   :  { %v705_v43 = vadd.f32 %v703_v42, %v1822_v44  ;;  %v728_v5 = vadd.f32 %v726_v16, %v1828_v49 }
 0x362   :  { %v1413_v45 = vmul.f32 -1.442695, %v705_v43  ;;  %v1414_v21 = vmul.f32 -1.442695, %v728_v5 }
 0x364   :  { %1482 = vpow2.f32 %v1413_v45 }
 0x365   :  { %1484 = vpow2.f32 %v1414_v21 }
 0x36a   :  { %v1483_v47 = vpop.eup %1482 }
 0x36b   :  { %v1485_v9 = vpop.eup %1484  ;;  %v709_v48 = vadd.f32 1.0, %v1483_v47 }
 0x36c   :  { %v732_v25 = vadd.f32 1.0, %v1485_v9 }
 0x36d   :  { %1486 = vrcp.f32 %v709_v48  ;;  %v721_v56 = vand.u32 2147483648, %v709_v48  ;;  %v719_v60 = vand.u32 2147483647, %v709_v48  ;;  %vm715_vm7 = vweird.f32 %v709_v48 }
 0x36e   :  { %1488 = vrcp.f32 %v732_v25  ;;  %v744_v10 = vand.u32 2147483648, %v732_v25  ;;  %vm738_vm12 = vweird.f32 %v732_v25  ;;  %v742_v11 = vand.u32 2147483647, %v732_v25 }
 0x36f   :  { %v722_v0 = vor.u32 1.1754944e-38, %v721_v56  ;;  %vm720_vm10 = vcmp.eq.f32.partialorder %v719_v60, 8.507059e+37 }
 0x370   :  { %v745_v15 = vor.u32 1.1754944e-38, %v744_v10  ;;  %vm743_vm14 = vcmp.eq.f32.partialorder %v742_v11, 8.507059e+37 }
 0x373   :  { %v1487_v50 = vpop.eup %1486 }
 0x374   :  { %v1489_v51 = vpop.eup %1488  ;;  %v711_v52 = vmul.f32 %v1487_v50, %v709_v48  ;;  %vm716_vm6 = vweird.f32 %v1487_v50 }
 0x375   :  { %v734_v54 = vmul.f32 %v1489_v51, %v732_v25  ;;  %vm717_vm8 = vmor %vm715_vm7, %vm716_vm6  ;;  %vm739_vm11 = vweird.f32 %v1489_v51 }
 0x376   :  { %v712_v55 = vsub.f32 1.0, %v711_v52  ;;  %vm740_vm13 = vmor %vm738_vm12, %vm739_vm11 }
 0x377   :  { %v735_v57 = vsub.f32 1.0, %v734_v54 }
 0x378   :  { %v713_v59 = vmul.f32 %v1487_v50, %v712_v55 }
 0x379   :  { %v736_v62 = vmul.f32 %v1489_v51, %v735_v57 }
 0x37a   :  { %v714_v63 = vadd.f32 %v1487_v50, %v713_v59 }
 0x37b   :  { %v737_v7 = vadd.f32 %v1489_v51, %v736_v62 }
 0x37c   :  { %v718_v4 = vsel %vm717_vm8, %v1487_v50, %v714_v63 }
 0x37d   :  { %v723_v6 = vsel %vm720_vm10, %v722_v0, %v718_v4  ;;  %v741_v14 = vsel %vm740_vm13, %v1489_v51, %v737_v7  ;;  %vm884_vm10 = vcmask 259077  }
 0x37e   :  { %v751_v8 = vmul.f32 %v749_v2, %v723_v6  ;;  %v746_v17 = vsel %vm743_vm14, %v745_v15, %v741_v14 }
 0x37f   :  { %v754_v19 = vsub.f32 1.0, %v746_v17  ;;  %v758_v24 = vmul.f32 %v756_v20, %v746_v17 }
 0x380   :  { %v752_v13 = vadd.f32 %v751_v8, %v1836_v18 }
 0x382   :  { %1490 = vtanh.f32 %v752_v13 }
 0x388   :  { %v1491_v22 = vpop.eup %1490 }
 0x389   :  { %v755_v23 = vmul.f32 %v1491_v22, %v754_v19 }
 0x38b   :  { %v1942_v26 = vadd.f32 %v758_v24, %v755_v23 }
 0x38d   :  { %761 = vst.msk [vmem:[#allocation2 - $0x3] sm:$0x10] %vm760_vm15, %v1942_v26  ;;  %v763_v27 = vrot.slane %v1942_v26, 4  ;;  %v880_v2 = vrot.slane %v1942_v26, 7 }
 0x38f   :  { %1415 = vmatmul.msk.f32.vlgmr.msra.gmra.mxu1 %vm155_vm9, %v763_v27  ;;  %1416 = vmatmul.msk.f32.vlgmr.msra.gmra.mxu2 %vm155_vm9, %v763_v27 }
 0x390   :  { %1417 = vmatmul.msk.f32.vlgmr.msrb.gmra.mxu3 %vm155_vm9, %v763_v27  ;;  %1066 = vmatpush.msra.mxu1 %v1742_v29 }
 0x392   :  { %1067 = vmatpush.msra.mxu1 %v1754_v32 }
 0x394   :  { %1068 = vmatpush.msra.mxu1 %v1764_v34 }
 0x396   :  { %1069 = vmatpush.msra.mxu1 %v1774_v36 }
 0x40c   :  { %v783_v28 = vpop.f32.mrf.mxu1 }
 0x40d   :  { %v784_v30 = vadd.f32 %v783_v28, %v1819_v39 }
 0x40f   :  { %v827_v31 = vrot.slane %v784_v30, 3 }
 0x411   :  { %v829_v33 = vadd.f32 %v827_v31, %v1822_v44  ;;  %v1142_v31 = vld [vmem:[%s2070_s6 + $0x30] sm:$0xff] }
 0x412   :  { %v803_v35 = vpop.f32.mrf.mxu2 }
 0x413   :  { %v1418_v37 = vmul.f32 -1.442695, %v829_v33  ;;  %v804_v40 = vadd.f32 %v803_v35, %v1825_v46  ;;  %v823_v42 = vpop.f32.mrf.mxu3  ;;  %v1141_v33 = vld [vmem:[%s2070_s6 + $0x28] sm:$0xff] }
 0x414   :  { %v824_v5 = vadd.f32 %v823_v42, %v1833_v61 }
 0x415   :  { %1492 = vpow2.f32 %v1418_v37  ;;  %v850_v38 = vrot.slane %v804_v40, 3 }
 0x416   :  { %v873_v52 = vrot.slane %v824_v5, 3 }
 0x417   :  { %v852_v29 = vadd.f32 %v850_v38, %v1828_v49  ;;  %v1140_v38 = vld [vmem:[%s2070_s6 + $0x20] sm:$0xff] }
 0x419   :  { %v1419_v1 = vmul.f32 -1.442695, %v852_v29 }
 0x41b   :  { %v1493_v32 = vpop.eup %1492  ;;  %1494 = vpow2.f32 %v1419_v1 }
 0x41c   :  { %v833_v34 = vadd.f32 1.0, %v1493_v32 }
 0x41e   :  { %1496 = vrcp.f32 %v833_v34  ;;  %v845_v43 = vand.u32 2147483648, %v833_v34  ;;  %v843_v21 = vand.u32 2147483647, %v833_v34  ;;  %vm839_vm2 = vweird.f32 %v833_v34 }
 0x420   :  { %v846_v25 = vor.u32 1.1754944e-38, %v845_v43  ;;  %vm844_vm4 = vcmp.eq.f32.partialorder %v843_v21, 8.507059e+37 }
 0x421   :  { %v1495_v36 = vpop.eup %1494 }
 0x422   :  { %v856_v12 = vadd.f32 1.0, %v1495_v36 }
 0x424   :  { %v1497_v41 = vpop.eup %1496  ;;  %1498 = vrcp.f32 %v856_v12  ;;  %v868_v55 = vand.u32 2147483648, %v856_v12  ;;  %v866_v57 = vand.u32 2147483647, %v856_v12  ;;  %vm862_vm6 = vweird.f32 %v856_v12 }
 0x425   :  { %v835_v3 = vmul.f32 %v1497_v41, %v833_v34  ;;  %vm840_vm1 = vweird.f32 %v1497_v41  ;;  %v1139_v34 = vld [vmem:[%s2070_s6 + $0x18] sm:$0xff] }
 0x426   :  { %vm841_vm3 = vmor %vm839_vm2, %vm840_vm1  ;;  %v869_v60 = vor.u32 1.1754944e-38, %v868_v55  ;;  %vm867_vm8 = vcmp.eq.f32.partialorder %v866_v57, 8.507059e+37 }
 0x427   :  { %v836_v16 = vsub.f32 1.0, %v835_v3 }
 0x429   :  { %v837_v45 = vmul.f32 %v1497_v41, %v836_v16  ;;  %v1138_v16 = vld [vmem:[%s2070_s6 + $0x10] sm:$0xff] }
 0x42a   :  { %v1499_v47 = vpop.eup %1498 }
 0x42b   :  { %v858_v9 = vmul.f32 %v1499_v47, %v856_v12  ;;  %v838_v48 = vadd.f32 %v1497_v41, %v837_v45  ;;  %vm863_vm5 = vweird.f32 %v1499_v47  ;;  %v1137_v45 = vld [vmem:[%s2070_s6 + $0x8] sm:$0xff] }
 0x42c   :  { %vm864_vm7 = vmor %vm862_vm6, %vm863_vm5 }
 0x42d   :  { %v859_v50 = vsub.f32 1.0, %v858_v9  ;;  %v842_v51 = vsel %vm841_vm3, %v1497_v41, %v838_v48  ;;  %v1136_v48 = vld [vmem:[%s2070_s6] sm:$0xff] }
 0x42e   :  { %v847_v53 = vsel %vm844_vm4, %v846_v25, %v842_v51  ;;  %v1135_v51 = vld [vmem:[%s2065_s1] sm:$0x3f]  ;;  %vm1008_vm4 = vcmask 260102  }
 0x42f   :  { %v860_v54 = vmul.f32 %v1499_v47, %v859_v50  ;;  %v875_v56 = vmul.f32 %v873_v52, %v847_v53 }
 0x431   :  { %v861_v58 = vadd.f32 %v1499_v47, %v860_v54  ;;  %v876_v59 = vadd.f32 %v875_v56, %v1836_v18 }
 0x433   :  { %v865_v62 = vsel %vm864_vm7, %v1499_v47, %v861_v58  ;;  %1500 = vtanh.f32 %v876_v59 }
 0x434   :  { %v870_v63 = vsel %vm867_vm8, %v869_v60, %v865_v62 }
 0x435   :  { %v878_v0 = vsub.f32 1.0, %v870_v63  ;;  %v882_v7 = vmul.f32 %v880_v2, %v870_v63 }
 0x439   :  { %v1501_v4 = vpop.eup %1500 }
 0x43a   :  { %v879_v6 = vmul.f32 %v1501_v4, %v878_v0 }
 0x43c   :  { %v1960_v8 = vadd.f32 %v882_v7, %v879_v6 }
 0x43e   :  { %885 = vst.msk [vmem:[#allocation2 - $0x3] sm:$0x20] %vm884_vm10, %v1960_v8  ;;  %v887_v10 = vrot.slane %v1960_v8, 5  ;;  %v1004_v60 = vrot.slane %v1960_v8, 7 }
 0x440   :  { %1420 = vmatmul.msk.f32.vlgmr.msrb.gmra.mxu0 %vm155_vm9, %v887_v10  ;;  %1421 = vmatmul.msk.f32.vlgmr.msrb.gmra.mxu1 %vm155_vm9, %v887_v10 }
 0x441   :  { %1422 = vmatmul.msk.f32.vlgmr.msrb.gmra.mxu2 %vm155_vm9, %v887_v10 }
 0x4bd   :  { %v907_v11 = vpop.f32.mrf.mxu0  ;;  %v927_v13 = vpop.f32.mrf.mxu1 }
 0x4be   :  { %v908_v14 = vadd.f32 %v907_v11, %v1819_v39  ;;  %v928_v15 = vadd.f32 %v927_v13, %v1825_v46  ;;  %v1143_v39 = vld [vmem:[%s2070_s6 + $0x38] sm:$0xff] }
 0x4bf   :  { %1159 = vmatpush.msra.mxu2 %v1143_v39 }
 0x4c0   :  { %v951_v17 = vrot.slane %v908_v14, 2  ;;  %v974_v19 = vrot.slane %v928_v15, 2  ;;  %v1532_v14 = vld [vmem:[%s2069_s5] sm:$0x7] }
 0x4c1   :  { %1160 = vmatpush.msra.mxu2 %v1142_v31 }
 0x4c2   :  { %v953_v20 = vadd.f32 %v951_v17, %v1822_v44  ;;  %v976_v22 = vadd.f32 %v974_v19, %v1828_v49 }
 0x4c3   :  { %1161 = vmatpush.msra.mxu2 %v1141_v33 }
 0x4c4   :  { %v1423_v23 = vmul.f32 -1.442695, %v953_v20  ;;  %v1424_v24 = vmul.f32 -1.442695, %v976_v22  ;;  %v947_v1 = vpop.f32.mrf.mxu2 }
 0x4c5   :  { %1162 = vmatpush.msra.mxu2 %v1140_v38  ;;  %v948_v41 = vadd.f32 %v947_v1, %v1833_v61  ;;  %v1251_v1 = vld [vmem:[%s2073_s9 + $0x8] sm:$0xff] }
 0x4c6   :  { %1502 = vpow2.f32 %v1423_v23 }
 0x4c7   :  { %1504 = vpow2.f32 %v1424_v24  ;;  %1163 = vmatpush.msra.mxu2 %v1139_v34  ;;  %v997_v9 = vrot.slane %v948_v41, 2  ;;  %v1250_v41 = vld [vmem:[%s2073_s9] sm:$0xff] }
 0x4c9   :  { %1164 = vmatpush.msra.mxu2 %v1138_v16 }
 0x4cb   :  { %1165 = vmatpush.msra.mxu2 %v1137_v45 }
 0x4cc   :  { %v1503_v26 = vpop.eup %1502 }
 0x4cd   :  { %v1505_v27 = vpop.eup %1504  ;;  %v957_v28 = vadd.f32 1.0, %v1503_v26  ;;  %1166 = vmatpush.msra.mxu2 %v1136_v48 }
 0x4ce   :  { %v980_v30 = vadd.f32 1.0, %v1505_v27  ;;  %1430 = vmatmul.msk.f32.vlgmr.msra.gmra.mxu2 %vm57_vm0, %v1135_v51  ;;  %vm1227_vm0 = vcmask 1045504  }
 0x4cf   :  { %1506 = vrcp.f32 %v957_v28  ;;  %v969_v12 = vand.u32 2147483648, %v957_v28  ;;  %v967_v42 = vand.u32 2147483647, %v957_v28  ;;  %vm963_vm12 = vweird.f32 %v957_v28 }
 0x4d0   :  { %1508 = vrcp.f32 %v980_v30  ;;  %v992_v52 = vand.u32 2147483648, %v980_v30  ;;  %vm986_vm1 = vweird.f32 %v980_v30  ;;  %v990_v54 = vand.u32 2147483647, %v980_v30 }
 0x4d1   :  { %v970_v21 = vor.u32 1.1754944e-38, %v969_v12  ;;  %vm968_vm14 = vcmp.eq.f32.partialorder %v967_v42, 8.507059e+37 }
 0x4d2   :  { %v993_v57 = vor.u32 1.1754944e-38, %v992_v52  ;;  %vm991_vm3 = vcmp.eq.f32.partialorder %v990_v54, 8.507059e+37 }
 0x4d5   :  { %v1507_v35 = vpop.eup %1506 }
 0x4d6   :  { %v1509_v37 = vpop.eup %1508  ;;  %v959_v40 = vmul.f32 %v1507_v35, %v957_v28  ;;  %vm964_vm11 = vweird.f32 %v1507_v35 }
 0x4d7   :  { %v982_v29 = vmul.f32 %v1509_v37, %v980_v30  ;;  %vm965_vm13 = vmor %vm963_vm12, %vm964_vm11  ;;  %vm987_vm15 = vweird.f32 %v1509_v37 }
 0x4d8   :  { %v960_v32 = vsub.f32 1.0, %v959_v40  ;;  %vm988_vm2 = vmor %vm986_vm1, %vm987_vm15  ;;  %v1252_v40 = vld [vmem:[%s2073_s9 + $0x10] sm:$0xff]  ;;  %vm1198_vm15 = vcmask 45056  }
 0x4d9   :  { %v983_v36 = vsub.f32 1.0, %v982_v29 }
 0x4da   :  { %v961_v3 = vmul.f32 %v1507_v35, %v960_v32 }
 0x4db   :  { %v984_v43 = vmul.f32 %v1509_v37, %v983_v36 }
 0x4dc   :  { %v962_v5 = vadd.f32 %v1507_v35, %v961_v3 }
 0x4dd   :  { %v985_v50 = vadd.f32 %v1509_v37, %v984_v43 }
 0x4de   :  { %v966_v47 = vsel %vm965_vm13, %v1507_v35, %v962_v5 }
 0x4df   :  { %v971_v25 = vsel %vm968_vm14, %v970_v21, %v966_v47  ;;  %v989_v56 = vsel %vm988_vm2, %v1509_v37, %v985_v50  ;;  %v1253_v37 = vld [vmem:[%s2073_s9 + $0x18] sm:$0xff]  ;;  %vm1132_vm14 = vcmask 261127  }
 0x4e0   :  { %v999_v53 = vmul.f32 %v997_v9, %v971_v25  ;;  %v994_v58 = vsel %vm991_vm3, %v993_v57, %v989_v56 }
 0x4e1   :  { %v1002_v59 = vsub.f32 1.0, %v994_v58  ;;  %v1006_v0 = vmul.f32 %v1004_v60, %v994_v58 }
 0x4e2   :  { %v1000_v55 = vadd.f32 %v999_v53, %v1836_v18 }
 0x4e4   :  { %1510 = vtanh.f32 %v1000_v55 }
 0x4ea   :  { %v1511_v62 = vpop.eup %1510 }
 0x4eb   :  { %v1003_v63 = vmul.f32 %v1511_v62, %v1002_v59 }
 0x4ed   :  { %v2002_v2 = vadd.f32 %v1006_v0, %v1003_v63 }
 0x4ef   :  { %1009 = vst.msk [vmem:[#allocation2 - $0x3] sm:$0x40] %vm1008_vm4, %v2002_v2  ;;  %v1011_v4 = vrot.slane %v2002_v2, 6  ;;  %v1128_v51 = vrot.slane %v2002_v2, 7  ;;  %v1257_v2 = vld [vmem:[%s2074_s10 + $0x18] sm:$0xff] }
 0x4f0   :  { %1273 = vmatpush.msrb.mxu1 %v1257_v2 }
 0x4f1   :  { %1425 = vmatmul.msk.f32.vlgmr.msra.gmra.mxu3 %vm155_vm9, %v1011_v4  ;;  %1426 = vmatmul.msk.f32.vlgmr.msra.gmra.mxu0 %vm155_vm9, %v1011_v4 }
 0x4f2   :  { %1427 = vmatmul.msk.f32.vlgmr.msra.gmra.mxu1 %vm155_vm9, %v1011_v4  ;;  %v1303_v4 = vld [vmem:[%s2075_s11 + $0x8] sm:$0xff] }
 0x56e   :  { %v1051_v6 = vpop.f32.mrf.mxu0 }
 0x56f   :  { %v1052_v7 = vadd.f32 %v1051_v6, %v1825_v46  ;;  %v1440_v46 = vld [vmem:[%s2071_s7] ss:$0 sm:$0xff]  ;;  %v1071_v35 = vpop.f32.mrf.mxu1  ;;  %v1256_v6 = vld [vmem:[%s2074_s10 + $0x10] sm:$0xff] }
 0x570   :  { %v1072_v32 = vadd.f32 %v1071_v35, %v1833_v61  ;;  %1274 = vmatpush.msrb.mxu1 %v1256_v6 }
 0x571   :  { %v1098_v8 = vrot.slane %v1052_v7, 1  ;;  %v1302_v7 = vld [vmem:[%s2075_s11] sm:$0xff] }
 0x572   :  { %v1121_v16 = vrot.slane %v1072_v32, 1 }
 0x573   :  { %v1100_v10 = vadd.f32 %v1098_v8, %v1828_v49  ;;  %v1168_v49 = vpop.f32.mrf.mxu2  ;;  %v1255_v8 = vld [vmem:[%s2074_s10 + $0x8] sm:$0xff] }
 0x574   :  { %v1031_v11 = vpop.f32.mrf.mxu3  ;;  %v1169_v26 = vadd.f32 %v1440_v46, %v1168_v49  ;;  %1275 = vmatpush.msrb.mxu1 %v1255_v8 }
 0x575   :  { %v1429_v13 = vmul.f32 -1.442695, %v1100_v10  ;;  %v1032_v15 = vadd.f32 %v1532_v14, %v1031_v11  ;;  %v1254_v10 = vld [vmem:[%s2074_s10] sm:$0xff] }
 0x576   :  { %1276 = vmatpush.msrb.mxu1 %v1254_v10 }
 0x577   :  { %1512 = vpow2.f32 %v1429_v13  ;;  %v1075_v17 = vrot.slane %v1032_v15, 1 }
 0x579   :  { %v1077_v19 = vadd.f32 %v1075_v17, %v1822_v44 }
 0x57b   :  { %v1428_v20 = vmul.f32 -1.442695, %v1077_v19 }
 0x57d   :  { %v1513_v22 = vpop.eup %1512  ;;  %1514 = vpow2.f32 %v1428_v20 }
 0x57e   :  { %v1104_v23 = vadd.f32 1.0, %v1513_v22 }
 0x580   :  { %1516 = vrcp.f32 %v1104_v23  ;;  %v1116_v45 = vand.u32 2147483648, %v1104_v23  ;;  %vm1110_vm11 = vweird.f32 %v1104_v23  ;;  %v1114_v47 = vand.u32 2147483647, %v1104_v23 }
 0x581   :  { %1518 = vtanh.f32 %v1169_v26  ;;  %v1301_v26 = vld [vmem:[%s2072_s8] sm:$0x1]  ;;  %s1560_s8 = smov [#allocation3]  }
 0x582   :  { %v1117_v25 = vor.u32 1.1754944e-38, %v1116_v45  ;;  %vm1115_vm13 = vcmp.eq.f32.partialorder %v1114_v47, 8.507059e+37  ;;  %s1355_s1 = sshll.u32 %s1560_s8, 4  ;;  %s1356_s1 = int_to_ptr.vmem [resolvable:$true] %s1355_s1 }
 0x583   :  { %v1515_v24 = vpop.eup %1514 }
 0x584   :  { %v1081_v27 = vadd.f32 1.0, %v1515_v24 }
 0x586   :  { %1520 = vrcp.f32 %v1081_v27  ;;  %v1517_v28 = vpop.eup %1516  ;;  %v1093_v29 = vand.u32 2147483648, %v1081_v27  ;;  %v1091_v36 = vand.u32 2147483647, %v1081_v27  ;;  %vm1087_vm6 = vweird.f32 %v1081_v27 }
 0x587   :  { %v1106_v30 = vmul.f32 %v1517_v28, %v1104_v23  ;;  %v1519_v39 = vpop.eup %1518  ;;  %vm1111_vm10 = vweird.f32 %v1517_v28 }
 0x588   :  { %1431 = vmatpush.xpose.msk.msrb.mxu3 %vm155_vm9, %v1519_v39  ;;  %1433 = vmatpush.msk.msrb.mxu0 %vm1227_vm0, %v1519_v39  ;;  %v1094_v42 = vor.u32 1.1754944e-38, %v1093_v29  ;;  %vm1092_vm8 = vcmp.eq.f32.partialorder %v1091_v36, 8.507059e+37  ;;  %vm1112_vm12 = vmor %vm1110_vm11, %vm1111_vm10  ;;  %vm1223_vm0 = vcmask 48128  }
 0x589   :  { %v1107_v33 = vsub.f32 1.0, %v1106_v30 }
 0x58a   :  { %1322 = vmatpush.msra.mxu0 %v1303_v4 }
 0x58b   :  { %v1108_v12 = vmul.f32 %v1517_v28, %v1107_v33  ;;  %v1441_v33 = vld [vmem:[%s2076_s12] ss:$0 sm:$0xff] }
 0x58c   :  { %v1521_v44 = vpop.eup %1520  ;;  %1293 = vmatpush.msra.mxu3 %v1253_v37  ;;  %1323 = vmatpush.msra.mxu0 %v1302_v7 }
 0x58d   :  { %v1083_v31 = vmul.f32 %v1521_v44, %v1081_v27  ;;  %vm1088_vm5 = vweird.f32 %v1521_v44  ;;  %v1109_v5 = vadd.f32 %v1517_v28, %v1108_v12 }
 0x58e   :  { %1294 = vmatpush.msra.mxu3 %v1252_v40  ;;  %vm1089_vm7 = vmor %vm1087_vm6, %vm1088_vm5  ;;  %vm1304_vm5 = vcmask 130048   ;;  %vm1335_vm6 = vcmask 1044480  }
 0x58f   :  { %v1084_v38 = vsub.f32 1.0, %v1083_v31  ;;  %v1113_v48 = vsel %vm1112_vm12, %v1517_v28, %v1109_v5 }
 0x590   :  { %1295 = vmatpush.msra.mxu3 %v1251_v1  ;;  %v1118_v50 = vsel %vm1115_vm13, %v1117_v25, %v1113_v48 }
 0x591   :  { %v1085_v34 = vmul.f32 %v1521_v44, %v1084_v38  ;;  %v1126_v52 = vsub.f32 1.0, %v1118_v50  ;;  %v1130_v54 = vmul.f32 %v1128_v51, %v1118_v50 }
 0x592   :  { %1296 = vmatpush.msra.mxu3 %v1250_v41 }
 0x593   :  { %v1086_v3 = vadd.f32 %v1521_v44, %v1085_v34 }
 0x595   :  { %v1090_v43 = vsel %vm1089_vm7, %v1521_v44, %v1086_v3 }
 0x596   :  { %v1095_v61 = vsel %vm1092_vm8, %v1094_v42, %v1090_v43 }
 0x597   :  { %v1123_v21 = vmul.f32 %v1121_v16, %v1095_v61 }
 0x599   :  { %v1124_v9 = vadd.f32 %v1123_v21, %v1836_v18 }
 0x59b   :  { %1522 = vtanh.f32 %v1124_v9 }
 0x5a1   :  { %v1523_v53 = vpop.eup %1522 }
 0x5a2   :  { %v1127_v55 = vmul.f32 %v1523_v53, %v1126_v52 }
 0x5a4   :  { %v1131_v56 = vadd.f32 %v1130_v54, %v1127_v55 }
 0x5a6   :  { %1133 = vst.msk [vmem:[#allocation2 - $0x3] sm:$0x80] %vm1132_vm14, %v1131_v56 }
 0x5ad   :  { %v1134_v57 = vld [vmem:[#allocation2] sm:$0x1f] }
 0x5ae   :  { %1432 = vmatmul.msk.f32.vlgmr.msrb.gmra.mxu3 %vm155_vm9, %v1134_v57 }
 0x5b6   :  { %1436 = vmatmul.msk.f32.vlgmr.msra.gmra.mxu3 %vm155_vm9, %v1134_v57 }
 0x631   :  { %v1195_v18 = vpop.f32.mrf.mxu3 }
 0x632   :  { %v1199_v58 = vsel %vm1198_vm15, %v1195_v18, -inf }
 0x633   :  { %1200 = vmax.xlane.f32.xlu0 %v1199_v58 }
 0x639   :  { %v1298_v39 = vpop.f32.mrf.mxu3 }
 0x6a6   :  { %v1201_v59 = vpop.xlane.xlu0 %1200 }
 0x6a7   :  { %v1202_v60 = vsub.f32 %v1195_v18, %v1201_v59 }
 0x6a9   :  { %v1203_v62 = vmul.f32 1.442695, %v1202_v60 }
 0x6ab   :  { %1524 = vpow2.f32 %v1203_v62 }
 0x6b1   :  { %v1525_v63 = vpop.eup %1524 }
 0x6b2   :  { %v1205_v0 = vsel %vm1198_vm15, %v1525_v63, 0.0 }
 0x6b3   :  { %1206 = vadd.xlane.f32.xlu0 %v1205_v0 }
 0x726   :  { %v1207_v11 = vpop.xlane.xlu0 %1206 }
 0x727   :  { %1526 = vrcp.f32 %v1207_v11  ;;  %v1219_v17 = vand.u32 2147483648, %v1207_v11  ;;  %v1217_v20 = vand.u32 2147483647, %v1207_v11  ;;  %vm1213_vm2 = vweird.f32 %v1207_v11 }
 0x729   :  { %v1220_v23 = vor.u32 1.1754944e-38, %v1219_v17  ;;  %vm1218_vm4 = vcmp.eq.f32.partialorder %v1217_v20, 8.507059e+37 }
 0x72d   :  { %v1527_v13 = vpop.eup %1526 }
 0x72e   :  { %v1209_v14 = vmul.f32 %v1527_v13, %v1207_v11  ;;  %vm1214_vm1 = vweird.f32 %v1527_v13 }
 0x72f   :  { %vm1215_vm3 = vmor %vm1213_vm2, %vm1214_vm1 }
 0x730   :  { %v1210_v15 = vsub.f32 1.0, %v1209_v14 }
 0x732   :  { %v1211_v19 = vmul.f32 %v1527_v13, %v1210_v15 }
 0x734   :  { %v1212_v22 = vadd.f32 %v1527_v13, %v1211_v19 }
 0x736   :  { %v1216_v46 = vsel %vm1215_vm3, %v1527_v13, %v1212_v22 }
 0x737   :  { %v1221_v49 = vsel %vm1218_vm4, %v1220_v23, %v1216_v46 }
 0x738   :  { %v1222_v24 = vmul.f32 %v1525_v63, %v1221_v49 }
 0x73a   :  { %1434 = vmatmul.msk.f32.vlgmr.msrb.gmra.mxu0 %vm1223_vm0, %v1222_v24 }
 0x742   :  { %1437 = vmatmul.msk.f32.vlgmr.msra.gmra.mxu0 %vm1304_vm5, %v1301_v26 }
 0x7b7   :  { %v1247_v27 = vpop.f32.mrf.mxu0 }
 0x7b8   :  { %1435 = vmatmul.msk.f32.vlgmr.msrb.gmra.mxu1 %vm155_vm9, %v1247_v27 }
 0x7bf   :  { %v1325_v28 = vpop.f32.mrf.mxu0 }
 0x7c0   :  { %v1328_v30 = vperm.slane %v1325_v28, 0 }
 0x835   :  { %v1278_v44 = vpop.f32.mrf.mxu1 }
 0x836   :  { %v1299_v31 = vadd.f32 %v1298_v39, %v1278_v44 }
 0x838   :  { %v1329_v35 = vadd.f32 %v1328_v30, %v1299_v31 }
 0x83a   :  { %v1334_v37 = vadd.f32 %v1441_v33, %v1329_v35 }
 0x83c   :  { %v1336_v40 = vsel %vm1335_vm6, %v1334_v37, -inf }
 0x83d   :  { %1337 = vmax.xlane.f32.xlu1 %v1336_v40 }
 0x8b0   :  { %v1338_v38 = vpop.xlane.xlu1 %1337 }
 0x8b1   :  { %v1339_v29 = vsub.f32 %v1334_v37, %v1338_v38 }
 0x8b3   :  { %v1340_v1 = vmul.f32 1.442695, %v1339_v29 }
 0x8b5   :  { %1528 = vpow2.f32 %v1340_v1 }
 0x8bb   :  { %v1529_v32 = vpop.eup %1528 }
 0x8bc   :  { %v1342_v34 = vsel %vm1335_vm6, %v1529_v32, 0.0 }
 0x8bd   :  { %1343 = vadd.xlane.f32.xlu1 %v1342_v34 }
 0x930   :  { %v1344_v36 = vpop.xlane.xlu1 %1343 }
 0x931   :  { %1530 = vlog2.f32 %v1344_v36 }
 0x937   :  { %v1531_v12 = vpop.eup %1530 }
 0x938   :  { %v1346_v41 = vmul.f32 0.6931472, %v1531_v12 }
 0x93a   :  { %v1347_v3 = vadd.f32 %v1346_v41, %v1338_v38 }
 0x93c   :  { %v1348_v42 = vsub.f32 %v1334_v37, %v1347_v3 }
 0x93e   :  { %1349 = vst [vmem:[#allocation3] sm:$0x1f] %v1348_v42 }
 0x93f   :  { %1360 = dma.vmem_to_hbm [thread:$0]  %s1356_s1, 128, %s1358_s3, [#allocation4]  }
 0x940   :  { %1557 = dma.done.wait [#allocation4], 128  }
 0x941   :  { %1558 = vsyncadd [#allocation4], 4294967168 }
 0x942   :  { %1365 = vsyncpa [#allocation4], 1 }

</bundles_post_ra>
